<compile_context>
chip_gen: v7x
topology: tpu7x:2x2x1
jax: 0.10.0
libtpu: 0.0.40
codegen_flags: <defaults>
</compile_context>

<pallas_src>
import functools

import jax
import jax.numpy as jnp
from jax import lax
from jax.experimental import pallas as pl
from jax.experimental.pallas import tpu as pltpu


def _pick_vmem_limit():
    """Generation-aware VMEM limit: ~75% of physical per-core VMEM
    (~96 MiB on v5e/v6e's 128 MiB, ~48 MiB on v7x's 64 MiB)."""
    cap = 64 * 1024 * 1024
    try:
        cap = int(pltpu.get_tpu_info().vmem_capacity_bytes)
    except Exception:
        pass  # conservative fallback works on every generation
    return max(32 * 1024 * 1024, min((cap * 3) // 4, 100 * 1024 * 1024))


_VMEM_LIMIT = _pick_vmem_limit()


# ----------------------------------------------------------------------------
# Small helpers (pure jnp, usable both inside kernels and as glue)
# ----------------------------------------------------------------------------
def _layer_norm(x, g, b, eps=1e-12):
    mu = jnp.mean(x, axis=-1, keepdims=True)
    var = jnp.mean((x - mu) ** 2, axis=-1, keepdims=True)
    return (x - mu) * lax.rsqrt(var + eps) * g + b


# ----------------------------------------------------------------------------
# Pallas kernel 1: fused L-layer BERT-style encoder, grid = (batch, layer)
# ----------------------------------------------------------------------------
def fused_encoder_kernel(x_ref, mask_ref,
                         wq_ref, bq_ref, wk_ref, bk_ref, wv_ref, bv_ref,
                         wo_ref, bo_ref, ln1g_ref, ln1b_ref,
                         w1_ref, b1_ref, w2_ref, b2_ref,
                         ln2g_ref, ln2b_ref,
                         out_ref, x_carry, *, num_heads):
    l = pl.program_id(1)
    n_layers = pl.num_programs(1)

    # Residual stream: load from the (HBM-fetched) input block at layer 0,
    # afterwards it lives in the f32 VMEM carry across the layer axis.
    @pl.when(l == 0)
    def _():
        x_carry[...] = x_ref[...].astype(jnp.float32)

    x = x_carry[...]                                    # (S, H) f32
    x_bf = x.astype(jnp.bfloat16)
    S, H = x.shape
    hd = H // num_heads

    # --- multi-head attention, head-batched --------------------------------
    # Head-major weights (NH, H, hd): one batched matmul per projection yields
    # (NH, S, hd) directly -- no lane-slicing / stacking of activations.
    # (1/sqrt(hd) is already folded into wq/bq at init time.)
    x_nb = jnp.broadcast_to(x_bf, (num_heads, S, H))    # shared by q/k/v
    qh = (jnp.einsum('nsh,nhd->nsd', x_nb, wq_ref[...],
                     preferred_element_type=jnp.float32)
          + bq_ref[...]).astype(jnp.bfloat16)
    kh = (jnp.einsum('nsh,nhd->nsd', x_nb, wk_ref[...],
                     preferred_element_type=jnp.float32)
          + bk_ref[...]).astype(jnp.bfloat16)
    vh = (jnp.einsum('nsh,nhd->nsd', x_nb, wv_ref[...],
                     preferred_element_type=jnp.float32)
          + bv_ref[...]).astype(jnp.bfloat16)

    bias = (1.0 - mask_ref[...]) * jnp.float32(-1e9)    # (1, S) key mask
    s = jnp.einsum('nqd,nkd->nqk', qh, kh,
                   preferred_element_type=jnp.float32) + bias[None, :, :]
    s = s - jnp.max(s, axis=-1, keepdims=True)          # f32 softmax statistics
    p = jnp.exp(s)
    inv = pl.reciprocal(jnp.sum(p, axis=-1, keepdims=True), approx=True)
    ctx = jnp.einsum('nqk,nkd->nqd', p.astype(jnp.bfloat16), vh,
                     preferred_element_type=jnp.float32) * inv   # (NH, S, hd)

    # Output projection: one batched matmul over heads + a single reduction
    # over the head axis (replaces the per-head python loop / accumulators).
    attn = jnp.einsum('nqd,ndh->nqh', ctx.astype(jnp.bfloat16), wo_ref[...],
                      preferred_element_type=jnp.float32)
    attn = jnp.sum(attn, axis=0) + bo_ref[...]          # (S, H) f32

    x1 = _layer_norm(x + attn, ln1g_ref[...], ln1b_ref[...])

    # --- feed-forward -------------------------------------------------------
    hid = jnp.dot(x1.astype(jnp.bfloat16), w1_ref[...],
                  preferred_element_type=jnp.float32) + b1_ref[...]
    hid = jax.nn.gelu(hid)   # TODO(synk): tanh approx; HF BERT uses exact erf GELU
    ffn = jnp.dot(hid.astype(jnp.bfloat16), w2_ref[...],
                  preferred_element_type=jnp.float32) + b2_ref[...]
    out = _layer_norm(x1 + ffn, ln2g_ref[...], ln2b_ref[...])

    x_carry[...] = out                                   # feed the next layer

    @pl.when(l == n_layers - 1)
    def _():
        out_ref[...] = out.astype(out_ref.dtype)          # last_hidden_state row


def transformer_encoder(x, key_mask, p, num_heads):
    """All L layers in one pallas_call; weights stream along the layer axis."""
    B, S, H = x.shape
    L = p["wq"].shape[0]
    NH = num_heads
    hd = H // NH
    F = p["w1"].shape[-1]

    def lspec(shape):
        # Weight blocks are indexed by the layer grid coordinate only; default
        # double-buffering prefetches layer l+1's weights during layer l.
        zeros = (0,) * len(shape)
        return pl.BlockSpec((None,) + shape, lambda b, l: (l,) + zeros)

    in_specs = [
        pl.BlockSpec((None, S, H), lambda b, l: (b, 0, 0)),   # x, one batch row
        pl.BlockSpec((None, 1, S), lambda b, l: (b, 0, 0)),   # key mask (B,1,S)
        lspec((NH, H, hd)), lspec((NH, 1, hd)),               # wq, bq (scale folded)
        lspec((NH, H, hd)), lspec((NH, 1, hd)),               # wk, bk
        lspec((NH, H, hd)), lspec((NH, 1, hd)),               # wv, bv
        lspec((NH, hd, H)), lspec((1, H)),                    # wo (head-major), bo
        lspec((1, H)), lspec((1, H)),                         # ln1 gamma/beta
        lspec((H, F)), lspec((1, F)),                         # w1, b1
        lspec((F, H)), lspec((1, H)),                         # w2, b2
        lspec((1, H)), lspec((1, H)),                         # ln2 gamma/beta
    ]
    out_spec = pl.BlockSpec((None, S, H), lambda b, l: (b, 0, 0))

    return pl.pallas_call(
        functools.partial(fused_encoder_kernel, num_heads=num_heads),
        out_shape=jax.ShapeDtypeStruct((B, S, H), x.dtype),
        grid=(B, L),                                    # batch parallel, layers inner
        in_specs=in_specs,
        out_specs=out_spec,
        scratch_shapes=[pltpu.VMEM((S, H), jnp.float32)],   # residual-stream carry
        compiler_params=pltpu.CompilerParams(
            dimension_semantics=("parallel", "arbitrary"),
            vmem_limit_bytes=_VMEM_LIMIT),
    )(x, key_mask,
      p["wq"], p["bq"], p["wk"], p["bk"], p["wv"], p["bv"],
      p["wo"], p["bo"], p["ln1_g"], p["ln1_b"],
      p["w1"], p["b1"], p["w2"], p["b2"],
      p["ln2_g"], p["ln2_b"])


# ----------------------------------------------------------------------------
# Pallas kernel 2: subtoken -> word mean pooling (scatter_reduce_'mean',
# include_self=False; untouched buckets stay zero)
# ----------------------------------------------------------------------------
def aggregate_kernel(ids_ref, x_ref, out_ref):
    ids = ids_ref[...]                                        # (RB, 1, S) int32
    x = x_ref[...]                                            # (RB, S, H) bf16
    RB, W, _ = out_ref.shape
    S = x.shape[1]
    w_iota = lax.broadcasted_iota(jnp.int32, (RB, W, S), 1)
    match = ids == w_iota                                     # (RB, W, S)
    sums = jnp.einsum('bws,bsh->bwh', match.astype(jnp.bfloat16), x,
                      preferred_element_type=jnp.float32)     # (RB, W, H)
    counts = jnp.sum(match.astype(jnp.float32), axis=-1, keepdims=True)  # lane reduce
    inv = pl.reciprocal(jnp.maximum(counts, 1.0), approx=True)
    out_ref[...] = (sums * inv).astype(out_ref.dtype)         # empty buckets stay 0


def aggregate_subtokens(subtok_emb, word_ids, n_words):
    """n_words is a *static* Python int (e.g. a config max), so there is no
    device->host sync and no per-shape recompile inside traced code."""
    B, S, H = subtok_emb.shape
    # bf16 packs two rows per sublane -> align the bucket axis to 16, not 8.
    w_pad = max(16, ((n_words + 15) // 16) * 16)
    ids3 = word_ids.astype(jnp.int32).reshape(B, 1, S)
    rb = next(d for d in (8, 4, 2, 1) if B % d == 0)          # rows per grid step

    out = pl.pallas_call(
        aggregate_kernel,
        out_shape=jax.ShapeDtypeStruct((B, w_pad, H), subtok_emb.dtype),
        grid=(B // rb,),
        in_specs=[
            pl.BlockSpec((rb, 1, S), lambda b: (b, 0, 0)),
            pl.BlockSpec((rb, S, H), lambda b: (b, 0, 0)),
        ],
        out_specs=pl.BlockSpec((rb, w_pad, H), lambda b: (b, 0, 0)),
        compiler_params=pltpu.CompilerParams(
            dimension_semantics=("parallel",),
            vmem_limit_bytes=_VMEM_LIMIT),
    )(ids3, subtok_emb)
    # drop bucket 0 (special/padding subtokens) and any alignment padding
    return out[:, 1:n_words, :]


# ----------------------------------------------------------------------------
# Glue: embeddings + parameter init + full forward
# ----------------------------------------------------------------------------
def embed(token_ids, ep):
    tok = jnp.take(ep["word_emb"], token_ids, axis=0)             # (B, S, H)
    pos = ep["pos_emb"][None, : token_ids.shape[1], :]            # (1, S, H)
    return _layer_norm(tok + pos, ep["ln_g"], ep["ln_b"]).astype(jnp.bfloat16)


def init_params(key, *, vocab, max_pos, H, F, n_layers, num_heads):
    assert H % num_heads == 0, "hidden size must be divisible by num_heads"
    hd = H // num_heads
    scale = 1.0 / float(hd) ** 0.5
    ki = iter(jax.random.split(key, 2 + 12 * n_layers))

    def dense(shape, std=0.02):
        return std * jax.random.normal(next(ki), shape, jnp.float32)

    emb = dict(
        word_emb=dense((vocab, H)),
        pos_emb=dense((max_pos, H)),
        ln_g=jnp.ones((H,), jnp.float32),
        ln_b=jnp.zeros((H,), jnp.float32),
    )

    def head_major_in(w2d):   # (H, H) dense weight -> (NH, H, hd) per-head view
        return jnp.transpose(w2d.reshape(H, num_heads, hd), (1, 0, 2))

    def one_layer():
        wq2, wk2, wv2, wo2 = (dense((H, H)) for _ in range(4))
        w1, w2 = dense((H, F)), dense((F, H))
        bq, bk, bv = (dense((num_heads, 1, hd)) for _ in range(3))
        bo, b1, b2 = dense((1, H)), dense((1, F)), dense((1, H))
        return dict(
            # 1/sqrt(hd) folded into the query projection once, at init time.
            wq=(head_major_in(wq2) * scale).astype(jnp.bfloat16), bq=bq * scale,
            wk=head_major_in(wk2).astype(jnp.bfloat16), bk=bk,
            wv=head_major_in(wv2).astype(jnp.bfloat16), bv=bv,
            # output projection head-major: concat_h(ctx_h) @ Wo
            # == sum_h ctx_h @ Wo[h*hd:(h+1)*hd, :] == sum_h ctx_h @ wo[h]
            wo=wo2.reshape(num_heads, hd, H).astype(jnp.bfloat16), bo=bo,
            ln1_g=jnp.ones((1, H), jnp.float32), ln1_b=jnp.zeros((1, H), jnp.float32),
            w1=w1.astype(jnp.bfloat16), b1=b1,
            w2=w2.astype(jnp.bfloat16), b2=b2,
            ln2_g=jnp.ones((1, H), jnp.float32), ln2_b=jnp.zeros((1, H), jnp.float32),
        )

    layers = [one_layer() for _ in range(n_layers)]
    stacked = jax.tree_util.tree_map(lambda *xs: jnp.stack(xs), *layers)  # (L, ...)
    return dict(embeddings=emb, layers=stacked)


def word_transformer_encoder(token_ids, word_ids, attn_mask, params, num_heads, n_words):
    """Forward pass mirroring WordTransformerEncoder.forward:
    transformer(last_hidden_state) -> mean-pool subtokens into words."""
    x = embed(token_ids, params["embeddings"])                    # (B, S, H) bf16
    key_mask = attn_mask.astype(jnp.float32)[:, None, :]          # (B, 1, S)
    x = transformer_encoder(x, key_mask, params["layers"], num_heads)
    return aggregate_subtokens(x, word_ids, n_words)              # word embeddings


# ----------------------------------------------------------------------------
if __name__ == "__main__":
    B, S, H, NH, F, L, VOCAB = 2, 8, 32, 4, 64, 2, 50

    key = jax.random.PRNGKey(0)
    k_tok, k_par = jax.random.split(key)

    token_ids = jax.random.randint(k_tok, (B, S), 0, VOCAB, dtype=jnp.int32)
    # word_ids: 0 = special/pad subtokens (None in HF .word_ids()), k>0 = word k.
    word_ids = jnp.array([[0, 1, 2, 2, 3, 4, 5, 0],
                          [0, 1, 1, 2, 3, 0, 0, 0]], dtype=jnp.int32)
    attn_mask = jnp.array([[1, 1, 1, 1, 1, 1, 1, 1],
                           [1, 1, 1, 1, 1, 0, 0, 0]], dtype=jnp.float32)

    params = init_params(k_par, vocab=VOCAB, max_pos=S, H=H, F=F,
                         n_layers=L, num_heads=NH)

    # n_words = max(word_ids) + 1, computed once on concrete host-side data so
    # the pooling kernel uses a static bucket count (no sync/recompile in jit).
    n_words = int(word_ids.max()) + 1

    out = word_transformer_encoder(token_ids, word_ids, attn_mask, params, NH, n_words)
    out = jax.block_until_ready(out)

    assert out.shape == (B, n_words - 1, H), out.shape
    assert bool(jnp.all(jnp.isfinite(out.astype(jnp.float32))))
    print("KERNEL_OK")
</pallas_src>

<mosaic_0001>
module attributes {stable_mosaic.version = 11 : i64} {
  func.func @fused_encoder_kernel(%arg0: i32, %arg1: i32, %arg2: memref<1x8x32xbf16, #tpu.memory_space<vmem>>, %arg3: memref<1x1x8xf32, #tpu.memory_space<vmem>>, %arg4: memref<1x4x32x8xbf16, #tpu.memory_space<vmem>>, %arg5: memref<1x4x1x8xf32, #tpu.memory_space<vmem>>, %arg6: memref<1x4x32x8xbf16, #tpu.memory_space<vmem>>, %arg7: memref<1x4x1x8xf32, #tpu.memory_space<vmem>>, %arg8: memref<1x4x32x8xbf16, #tpu.memory_space<vmem>>, %arg9: memref<1x4x1x8xf32, #tpu.memory_space<vmem>>, %arg10: memref<1x4x8x32xbf16, #tpu.memory_space<vmem>>, %arg11: memref<1x1x32xf32, #tpu.memory_space<vmem>>, %arg12: memref<1x1x32xf32, #tpu.memory_space<vmem>>, %arg13: memref<1x1x32xf32, #tpu.memory_space<vmem>>, %arg14: memref<1x32x64xbf16, #tpu.memory_space<vmem>>, %arg15: memref<1x1x64xf32, #tpu.memory_space<vmem>>, %arg16: memref<1x64x32xbf16, #tpu.memory_space<vmem>>, %arg17: memref<1x1x32xf32, #tpu.memory_space<vmem>>, %arg18: memref<1x1x32xf32, #tpu.memory_space<vmem>>, %arg19: memref<1x1x32xf32, #tpu.memory_space<vmem>>, %arg20: memref<1x8x32xbf16, #tpu.memory_space<vmem>>, %arg21: memref<8x32xf32, #tpu.memory_space<vmem>>) attributes {dimension_semantics = [#tpu.dimension_semantics<parallel>, #tpu.dimension_semantics<arbitrary>], iteration_bounds = array<i64: 2, 2>, scalar_prefetch = 0 : i64, scratch_operands = 1 : i64, tpu.core_type = #tpu.core_type<tc>, window_params = [{transform_indices = @transform_0, window_bounds = array<i64: 1, 8, 32>}, {transform_indices = @transform_1, window_bounds = array<i64: 1, 1, 8>}, {transform_indices = @transform_2, window_bounds = array<i64: 1, 4, 32, 8>}, {transform_indices = @transform_3, window_bounds = array<i64: 1, 4, 1, 8>}, {transform_indices = @transform_4, window_bounds = array<i64: 1, 4, 32, 8>}, {transform_indices = @transform_5, window_bounds = array<i64: 1, 4, 1, 8>}, {transform_indices = @transform_6, window_bounds = array<i64: 1, 4, 32, 8>}, {transform_indices = @transform_7, window_bounds = array<i64: 1, 4, 1, 8>}, {transform_indices = @transform_8, window_bounds = array<i64: 1, 4, 8, 32>}, {transform_indices = @transform_9, window_bounds = array<i64: 1, 1, 32>}, {transform_indices = @transform_10, window_bounds = array<i64: 1, 1, 32>}, {transform_indices = @transform_11, window_bounds = array<i64: 1, 1, 32>}, {transform_indices = @transform_12, window_bounds = array<i64: 1, 32, 64>}, {transform_indices = @transform_13, window_bounds = array<i64: 1, 1, 64>}, {transform_indices = @transform_14, window_bounds = array<i64: 1, 64, 32>}, {transform_indices = @transform_15, window_bounds = array<i64: 1, 1, 32>}, {transform_indices = @transform_16, window_bounds = array<i64: 1, 1, 32>}, {transform_indices = @transform_17, window_bounds = array<i64: 1, 1, 32>}, {transform_indices = @transform_18, window_bounds = array<i64: 1, 8, 32>}]} {
    %c0_i32 = arith.constant 0 : i32
    %0 = arith.cmpi eq, %arg1, %c0_i32 : i32
    %1 = arith.extui %0 : i1 to i32
    %c0_i32_0 = arith.constant 0 : i32
    %2 = arith.cmpi ne, %1, %c0_i32_0 : i32
    scf.if %2 {
      %c0_89 = arith.constant 0 : index
      %c0_90 = arith.constant 0 : index
      %c0_91 = arith.constant 0 : index
      %149 = vector.load %arg2[%c0_89, %c0_90, %c0_91] : memref<1x8x32xbf16, #tpu.memory_space<vmem>>, vector<1x8x32xbf16>
      %150 = vector.shape_cast %149 : vector<1x8x32xbf16> to vector<8x32xbf16>
      %151 = arith.extf %150 : vector<8x32xbf16> to vector<8x32xf32>
      %c0_92 = arith.constant 0 : index
      %c0_93 = arith.constant 0 : index
      %152 = vector.load %arg21[%c0_92, %c0_93] : memref<8x32xf32, #tpu.memory_space<vmem>>, vector<8x32xf32>
      tpu.vector_store %arg21[%c0_92, %c0_93], %151 {strides = array<i32>} : memref<8x32xf32, #tpu.memory_space<vmem>>, vector<8x32xf32>,
    } else {
    }
    %c0 = arith.constant 0 : index
    %c0_1 = arith.constant 0 : index
    %3 = vector.load %arg21[%c0, %c0_1] : memref<8x32xf32, #tpu.memory_space<vmem>>, vector<8x32xf32>
    %4 = arith.truncf %3 : vector<8x32xf32> to vector<8x32xbf16>
    %5 = vector.shape_cast %4 : vector<8x32xbf16> to vector<1x8x32xbf16>
    %6 = vector.broadcast %5 : vector<1x8x32xbf16> to vector<4x8x32xbf16>
    %c0_2 = arith.constant 0 : index
    %c0_3 = arith.constant 0 : index
    %c0_4 = arith.constant 0 : index
    %c0_5 = arith.constant 0 : index
    %7 = vector.load %arg4[%c0_2, %c0_3, %c0_4, %c0_5] : memref<1x4x32x8xbf16, #tpu.memory_space<vmem>>, vector<1x4x32x8xbf16>
    %8 = vector.shape_cast %7 : vector<1x4x32x8xbf16> to vector<4x32x8xbf16>
    "tpu.trace_start"() <{level = 10 : i32, message = "nsh,nhd->nsd"}> : () -> ()
    %cst = arith.constant dense<0.000000e+00> : vector<4x8x8xf32>
    %9 = tpu.matmul %6, %8, %cst {dimension_numbers = #tpu.dot_dimension_numbers<[2], [1], [1], [2], [0, 0, 0, 1, 1, 2], [0], [0]>} : vector<4x8x32xbf16>, vector<4x32x8xbf16>, vector<4x8x8xf32> -> vector<4x8x8xf32>
    "tpu.trace_stop"() : () -> ()
    %c0_6 = arith.constant 0 : index
    %c0_7 = arith.constant 0 : index
    %c0_8 = arith.constant 0 : index
    %c0_9 = arith.constant 0 : index
    %10 = vector.load %arg5[%c0_6, %c0_7, %c0_8, %c0_9] : memref<1x4x1x8xf32, #tpu.memory_space<vmem>>, vector<1x4x1x8xf32>
    %11 = vector.shape_cast %10 : vector<1x4x1x8xf32> to vector<4x1x8xf32>
    %12 = vector.broadcast %11 : vector<4x1x8xf32> to vector<4x8x8xf32>
    %13 = arith.addf %9, %12 : vector<4x8x8xf32>
    %14 = arith.truncf %13 : vector<4x8x8xf32> to vector<4x8x8xbf16>
    %c0_10 = arith.constant 0 : index
    %c0_11 = arith.constant 0 : index
    %c0_12 = arith.constant 0 : index
    %c0_13 = arith.constant 0 : index
    %15 = vector.load %arg6[%c0_10, %c0_11, %c0_12, %c0_13] : memref<1x4x32x8xbf16, #tpu.memory_space<vmem>>, vector<1x4x32x8xbf16>
    %16 = vector.shape_cast %15 : vector<1x4x32x8xbf16> to vector<4x32x8xbf16>
    "tpu.trace_start"() <{level = 10 : i32, message = "nsh,nhd->nsd"}> : () -> ()
    %cst_14 = arith.constant dense<0.000000e+00> : vector<4x8x8xf32>
    %17 = tpu.matmul %6, %16, %cst_14 {dimension_numbers = #tpu.dot_dimension_numbers<[2], [1], [1], [2], [0, 0, 0, 1, 1, 2], [0], [0]>} : vector<4x8x32xbf16>, vector<4x32x8xbf16>, vector<4x8x8xf32> -> vector<4x8x8xf32>
    "tpu.trace_stop"() : () -> ()
    %c0_15 = arith.constant 0 : index
    %c0_16 = arith.constant 0 : index
    %c0_17 = arith.constant 0 : index
    %c0_18 = arith.constant 0 : index
    %18 = vector.load %arg7[%c0_15, %c0_16, %c0_17, %c0_18] : memref<1x4x1x8xf32, #tpu.memory_space<vmem>>, vector<1x4x1x8xf32>
    %19 = vector.shape_cast %18 : vector<1x4x1x8xf32> to vector<4x1x8xf32>
    %20 = vector.broadcast %19 : vector<4x1x8xf32> to vector<4x8x8xf32>
    %21 = arith.addf %17, %20 : vector<4x8x8xf32>
    %22 = arith.truncf %21 : vector<4x8x8xf32> to vector<4x8x8xbf16>
    %c0_19 = arith.constant 0 : index
    %c0_20 = arith.constant 0 : index
    %c0_21 = arith.constant 0 : index
    %c0_22 = arith.constant 0 : index
    %23 = vector.load %arg8[%c0_19, %c0_20, %c0_21, %c0_22] : memref<1x4x32x8xbf16, #tpu.memory_space<vmem>>, vector<1x4x32x8xbf16>
    %24 = vector.shape_cast %23 : vector<1x4x32x8xbf16> to vector<4x32x8xbf16>
    "tpu.trace_start"() <{level = 10 : i32, message = "nsh,nhd->nsd"}> : () -> ()
    %cst_23 = arith.constant dense<0.000000e+00> : vector<4x8x8xf32>
    %25 = tpu.matmul %6, %24, %cst_23 {dimension_numbers = #tpu.dot_dimension_numbers<[2], [1], [1], [2], [0, 0, 0, 1, 1, 2], [0], [0]>} : vector<4x8x32xbf16>, vector<4x32x8xbf16>, vector<4x8x8xf32> -> vector<4x8x8xf32>
    "tpu.trace_stop"() : () -> ()
    %c0_24 = arith.constant 0 : index
    %c0_25 = arith.constant 0 : index
    %c0_26 = arith.constant 0 : index
    %c0_27 = arith.constant 0 : index
    %26 = vector.load %arg9[%c0_24, %c0_25, %c0_26, %c0_27] : memref<1x4x1x8xf32, #tpu.memory_space<vmem>>, vector<1x4x1x8xf32>
    %27 = vector.shape_cast %26 : vector<1x4x1x8xf32> to vector<4x1x8xf32>
    %28 = vector.broadcast %27 : vector<4x1x8xf32> to vector<4x8x8xf32>
    %29 = arith.addf %25, %28 : vector<4x8x8xf32>
    %30 = arith.truncf %29 : vector<4x8x8xf32> to vector<4x8x8xbf16>
    %c0_28 = arith.constant 0 : index
    %c0_29 = arith.constant 0 : index
    %c0_30 = arith.constant 0 : index
    %31 = vector.load %arg3[%c0_28, %c0_29, %c0_30] : memref<1x1x8xf32, #tpu.memory_space<vmem>>, vector<1x1x8xf32>
    %32 = vector.shape_cast %31 : vector<1x1x8xf32> to vector<1x8xf32>
    %cst_31 = arith.constant 1.000000e+00 : f32
    %33 = vector.broadcast %cst_31 : f32 to vector<1x8xf32>
    %34 = arith.subf %33, %32 : vector<1x8xf32>
    %cst_32 = arith.constant -1.000000e+09 : f32
    %35 = vector.broadcast %cst_32 : f32 to vector<1x8xf32>
    %36 = arith.mulf %34, %35 : vector<1x8xf32>
    "tpu.trace_start"() <{level = 10 : i32, message = "nqd,nkd->nqk"}> : () -> ()
    %cst_33 = arith.constant dense<0.000000e+00> : vector<4x8x8xf32>
    %37 = tpu.matmul %14, %22, %cst_33 {dimension_numbers = #tpu.dot_dimension_numbers<[2], [2], [1], [1], [0, 0, 0, 1, 1, 1], [0], [0]>} : vector<4x8x8xbf16>, vector<4x8x8xbf16>, vector<4x8x8xf32> -> vector<4x8x8xf32>
    "tpu.trace_stop"() : () -> ()
    %38 = vector.shape_cast %36 : vector<1x8xf32> to vector<1x1x8xf32>
    %39 = vector.broadcast %38 : vector<1x1x8xf32> to vector<4x8x8xf32>
    %40 = arith.addf %37, %39 : vector<4x8x8xf32>
    %cst_34 = arith.constant dense<0xFF800000> : vector<4x8xf32>
    %41 = vector.multi_reduction <maximumf>, %40, %cst_34 [2] : vector<4x8x8xf32> to vector<4x8xf32>
    %42 = vector.shape_cast %41 : vector<4x8xf32> to vector<4x8x1xf32>
    %43 = vector.broadcast %42 : vector<4x8x1xf32> to vector<4x8x8xf32>
    %44 = arith.subf %40, %43 : vector<4x8x8xf32>
    %45 = math.exp %44 : vector<4x8x8xf32>
    %cst_35 = arith.constant dense<0.000000e+00> : vector<4x8xf32>
    %46 = vector.multi_reduction <add>, %45, %cst_35 [2] : vector<4x8x8xf32> to vector<4x8xf32>
    %47 = vector.shape_cast %46 : vector<4x8xf32> to vector<4x8x1xf32>
    %48 = tpu.reciprocal %47 {approx = true} : vector<4x8x1xf32> -> vector<4x8x1xf32>
    %49 = arith.truncf %45 : vector<4x8x8xf32> to vector<4x8x8xbf16>
    "tpu.trace_start"() <{level = 10 : i32, message = "nqk,nkd->nqd"}> : () -> ()
    %cst_36 = arith.constant dense<0.000000e+00> : vector<4x8x8xf32>
    %50 = tpu.matmul %49, %30, %cst_36 {dimension_numbers = #tpu.dot_dimension_numbers<[2], [1], [1], [2], [0, 0, 0, 1, 1, 2], [0], [0]>} : vector<4x8x8xbf16>, vector<4x8x8xbf16>, vector<4x8x8xf32> -> vector<4x8x8xf32>
    "tpu.trace_stop"() : () -> ()
    %51 = vector.broadcast %48 : vector<4x8x1xf32> to vector<4x8x8xf32>
    %52 = arith.mulf %50, %51 : vector<4x8x8xf32>
    %53 = arith.truncf %52 : vector<4x8x8xf32> to vector<4x8x8xbf16>
    %c0_37 = arith.constant 0 : index
    %c0_38 = arith.constant 0 : index
    %c0_39 = arith.constant 0 : index
    %c0_40 = arith.constant 0 : index
    %54 = vector.load %arg10[%c0_37, %c0_38, %c0_39, %c0_40] : memref<1x4x8x32xbf16, #tpu.memory_space<vmem>>, vector<1x4x8x32xbf16>
    %55 = vector.shape_cast %54 : vector<1x4x8x32xbf16> to vector<4x8x32xbf16>
    "tpu.trace_start"() <{level = 10 : i32, message = "nqd,ndh->nqh"}> : () -> ()
    %cst_41 = arith.constant dense<0.000000e+00> : vector<4x8x32xf32>
    %56 = tpu.matmul %53, %55, %cst_41 {dimension_numbers = #tpu.dot_dimension_numbers<[2], [1], [1], [2], [0, 0, 0, 1, 1, 2], [0], [0]>} : vector<4x8x8xbf16>, vector<4x8x32xbf16>, vector<4x8x32xf32> -> vector<4x8x32xf32>
    "tpu.trace_stop"() : () -> ()
    %cst_42 = arith.constant dense<0.000000e+00> : vector<8x32xf32>
    %57 = vector.multi_reduction <add>, %56, %cst_42 [0] : vector<4x8x32xf32> to vector<8x32xf32>
    %c0_43 = arith.constant 0 : index
    %c0_44 = arith.constant 0 : index
    %c0_45 = arith.constant 0 : index
    %58 = vector.load %arg11[%c0_43, %c0_44, %c0_45] : memref<1x1x32xf32, #tpu.memory_space<vmem>>, vector<1x1x32xf32>
    %59 = vector.shape_cast %58 : vector<1x1x32xf32> to vector<1x32xf32>
    %60 = vector.broadcast %59 : vector<1x32xf32> to vector<8x32xf32>
    %61 = arith.addf %57, %60 : vector<8x32xf32>
    %62 = arith.addf %3, %61 : vector<8x32xf32>
    %c0_46 = arith.constant 0 : index
    %c0_47 = arith.constant 0 : index
    %c0_48 = arith.constant 0 : index
    %63 = vector.load %arg12[%c0_46, %c0_47, %c0_48] : memref<1x1x32xf32, #tpu.memory_space<vmem>>, vector<1x1x32xf32>
    %64 = vector.shape_cast %63 : vector<1x1x32xf32> to vector<1x32xf32>
    %c0_49 = arith.constant 0 : index
    %c0_50 = arith.constant 0 : index
    %c0_51 = arith.constant 0 : index
    %65 = vector.load %arg13[%c0_49, %c0_50, %c0_51] : memref<1x1x32xf32, #tpu.memory_space<vmem>>, vector<1x1x32xf32>
    %66 = vector.shape_cast %65 : vector<1x1x32xf32> to vector<1x32xf32>
    %cst_52 = arith.constant dense<0.000000e+00> : vector<8xf32>
    %67 = vector.multi_reduction <add>, %62, %cst_52 [1] : vector<8x32xf32> to vector<8xf32>
    %68 = vector.shape_cast %67 : vector<8xf32> to vector<8x1xf32>
    %cst_53 = arith.constant 3.200000e+01 : f32
    %69 = vector.broadcast %cst_53 : f32 to vector<8x1xf32>
    %70 = arith.divf %68, %69 : vector<8x1xf32>
    %71 = vector.broadcast %70 : vector<8x1xf32> to vector<8x32xf32>
    %72 = arith.subf %62, %71 : vector<8x32xf32>
    %73 = arith.mulf %72, %72 : vector<8x32xf32>
    %cst_54 = arith.constant dense<0.000000e+00> : vector<8xf32>
    %74 = vector.multi_reduction <add>, %73, %cst_54 [1] : vector<8x32xf32> to vector<8xf32>
    %75 = vector.shape_cast %74 : vector<8xf32> to vector<8x1xf32>
    %cst_55 = arith.constant 3.200000e+01 : f32
    %76 = vector.broadcast %cst_55 : f32 to vector<8x1xf32>
    %77 = arith.divf %75, %76 : vector<8x1xf32>
    %78 = vector.broadcast %70 : vector<8x1xf32> to vector<8x32xf32>
    %79 = arith.subf %62, %78 : vector<8x32xf32>
    %cst_56 = arith.constant 9.99999996E-13 : f32
    %80 = vector.broadcast %cst_56 : f32 to vector<8x1xf32>
    %81 = arith.addf %77, %80 : vector<8x1xf32>
    %82 = math.rsqrt %81 : vector<8x1xf32>
    %83 = vector.broadcast %82 : vector<8x1xf32> to vector<8x32xf32>
    %84 = arith.mulf %79, %83 : vector<8x32xf32>
    %85 = vector.broadcast %64 : vector<1x32xf32> to vector<8x32xf32>
    %86 = arith.mulf %84, %85 : vector<8x32xf32>
    %87 = vector.broadcast %66 : vector<1x32xf32> to vector<8x32xf32>
    %88 = arith.addf %86, %87 : vector<8x32xf32>
    %89 = arith.truncf %88 : vector<8x32xf32> to vector<8x32xbf16>
    %c0_57 = arith.constant 0 : index
    %c0_58 = arith.constant 0 : index
    %c0_59 = arith.constant 0 : index
    %90 = vector.load %arg14[%c0_57, %c0_58, %c0_59] : memref<1x32x64xbf16, #tpu.memory_space<vmem>>, vector<1x32x64xbf16>
    %91 = vector.shape_cast %90 : vector<1x32x64xbf16> to vector<32x64xbf16>
    %cst_60 = arith.constant dense<0.000000e+00> : vector<8x64xf32>
    %92 = tpu.matmul %89, %91, %cst_60 {dimension_numbers = #tpu.dot_dimension_numbers<[1], [0], [0], [1], [0, 0, 1, 1], [], []>} : vector<8x32xbf16>, vector<32x64xbf16>, vector<8x64xf32> -> vector<8x64xf32>
    %c0_61 = arith.constant 0 : index
    %c0_62 = arith.constant 0 : index
    %c0_63 = arith.constant 0 : index
    %93 = vector.load %arg15[%c0_61, %c0_62, %c0_63] : memref<1x1x64xf32, #tpu.memory_space<vmem>>, vector<1x1x64xf32>
    %94 = vector.shape_cast %93 : vector<1x1x64xf32> to vector<1x64xf32>
    %95 = vector.broadcast %94 : vector<1x64xf32> to vector<8x64xf32>
    %96 = arith.addf %92, %95 : vector<8x64xf32>
    %97 = arith.mulf %96, %96 : vector<8x64xf32>
    %98 = arith.mulf %96, %97 : vector<8x64xf32>
    %cst_64 = arith.constant 4.471500e-02 : f32
    %99 = vector.broadcast %cst_64 : f32 to vector<8x64xf32>
    %100 = arith.mulf %99, %98 : vector<8x64xf32>
    %101 = arith.addf %96, %100 : vector<8x64xf32>
    %cst_65 = arith.constant 0.797884583 : f32
    %102 = vector.broadcast %cst_65 : f32 to vector<8x64xf32>
    %103 = arith.mulf %102, %101 : vector<8x64xf32>
    %104 = math.tanh %103 : vector<8x64xf32>
    %cst_66 = arith.constant 1.000000e+00 : f32
    %105 = vector.broadcast %cst_66 : f32 to vector<8x64xf32>
    %106 = arith.addf %105, %104 : vector<8x64xf32>
    %cst_67 = arith.constant 5.000000e-01 : f32
    %107 = vector.broadcast %cst_67 : f32 to vector<8x64xf32>
    %108 = arith.mulf %107, %106 : vector<8x64xf32>
    %109 = arith.mulf %96, %108 : vector<8x64xf32>
    %110 = arith.truncf %109 : vector<8x64xf32> to vector<8x64xbf16>
    %c0_68 = arith.constant 0 : index
    %c0_69 = arith.constant 0 : index
    %c0_70 = arith.constant 0 : index
    %111 = vector.load %arg16[%c0_68, %c0_69, %c0_70] : memref<1x64x32xbf16, #tpu.memory_space<vmem>>, vector<1x64x32xbf16>
    %112 = vector.shape_cast %111 : vector<1x64x32xbf16> to vector<64x32xbf16>
    %cst_71 = arith.constant dense<0.000000e+00> : vector<8x32xf32>
    %113 = tpu.matmul %110, %112, %cst_71 {dimension_numbers = #tpu.dot_dimension_numbers<[1], [0], [0], [1], [0, 0, 1, 1], [], []>} : vector<8x64xbf16>, vector<64x32xbf16>, vector<8x32xf32> -> vector<8x32xf32>
    %c0_72 = arith.constant 0 : index
    %c0_73 = arith.constant 0 : index
    %c0_74 = arith.constant 0 : index
    %114 = vector.load %arg17[%c0_72, %c0_73, %c0_74] : memref<1x1x32xf32, #tpu.memory_space<vmem>>, vector<1x1x32xf32>
    %115 = vector.shape_cast %114 : vector<1x1x32xf32> to vector<1x32xf32>
    %116 = vector.broadcast %115 : vector<1x32xf32> to vector<8x32xf32>
    %117 = arith.addf %113, %116 : vector<8x32xf32>
    %118 = arith.addf %88, %117 : vector<8x32xf32>
    %c0_75 = arith.constant 0 : index
    %c0_76 = arith.constant 0 : index
    %c0_77 = arith.constant 0 : index
    %119 = vector.load %arg18[%c0_75, %c0_76, %c0_77] : memref<1x1x32xf32, #tpu.memory_space<vmem>>, vector<1x1x32xf32>
    %120 = vector.shape_cast %119 : vector<1x1x32xf32> to vector<1x32xf32>
    %c0_78 = arith.constant 0 : index
    %c0_79 = arith.constant 0 : index
    %c0_80 = arith.constant 0 : index
    %121 = vector.load %arg19[%c0_78, %c0_79, %c0_80] : memref<1x1x32xf32, #tpu.memory_space<vmem>>, vector<1x1x32xf32>
    %122 = vector.shape_cast %121 : vector<1x1x32xf32> to vector<1x32xf32>
    %cst_81 = arith.constant dense<0.000000e+00> : vector<8xf32>
    %123 = vector.multi_reduction <add>, %118, %cst_81 [1] : vector<8x32xf32> to vector<8xf32>
    %124 = vector.shape_cast %123 : vector<8xf32> to vector<8x1xf32>
    %cst_82 = arith.constant 3.200000e+01 : f32
    %125 = vector.broadcast %cst_82 : f32 to vector<8x1xf32>
    %126 = arith.divf %124, %125 : vector<8x1xf32>
    %127 = vector.broadcast %126 : vector<8x1xf32> to vector<8x32xf32>
    %128 = arith.subf %118, %127 : vector<8x32xf32>
    %129 = arith.mulf %128, %128 : vector<8x32xf32>
    %cst_83 = arith.constant dense<0.000000e+00> : vector<8xf32>
    %130 = vector.multi_reduction <add>, %129, %cst_83 [1] : vector<8x32xf32> to vector<8xf32>
    %131 = vector.shape_cast %130 : vector<8xf32> to vector<8x1xf32>
    %cst_84 = arith.constant 3.200000e+01 : f32
    %132 = vector.broadcast %cst_84 : f32 to vector<8x1xf32>
    %133 = arith.divf %131, %132 : vector<8x1xf32>
    %134 = vector.broadcast %126 : vector<8x1xf32> to vector<8x32xf32>
    %135 = arith.subf %118, %134 : vector<8x32xf32>
    %cst_85 = arith.constant 9.99999996E-13 : f32
    %136 = vector.broadcast %cst_85 : f32 to vector<8x1xf32>
    %137 = arith.addf %133, %136 : vector<8x1xf32>
    %138 = math.rsqrt %137 : vector<8x1xf32>
    %139 = vector.broadcast %138 : vector<8x1xf32> to vector<8x32xf32>
    %140 = arith.mulf %135, %139 : vector<8x32xf32>
    %141 = vector.broadcast %120 : vector<1x32xf32> to vector<8x32xf32>
    %142 = arith.mulf %140, %141 : vector<8x32xf32>
    %143 = vector.broadcast %122 : vector<1x32xf32> to vector<8x32xf32>
    %144 = arith.addf %142, %143 : vector<8x32xf32>
    %c0_86 = arith.constant 0 : index
    %c0_87 = arith.constant 0 : index
    %145 = vector.load %arg21[%c0_86, %c0_87] : memref<8x32xf32, #tpu.memory_space<vmem>>, vector<8x32xf32>
    tpu.vector_store %arg21[%c0_86, %c0_87], %144 {strides = array<i32>} : memref<8x32xf32, #tpu.memory_space<vmem>>, vector<8x32xf32>,
    %c1_i32 = arith.constant 1 : i32
    %146 = arith.cmpi eq, %arg1, %c1_i32 : i32
    %147 = arith.extui %146 : i1 to i32
    %c0_i32_88 = arith.constant 0 : i32
    %148 = arith.cmpi ne, %147, %c0_i32_88 : i32
    scf.if %148 {
      %149 = arith.truncf %144 : vector<8x32xf32> to vector<8x32xbf16>
      %c0_89 = arith.constant 0 : index
      %c0_90 = arith.constant 0 : index
      %c0_91 = arith.constant 0 : index
      %150 = vector.load %arg20[%c0_89, %c0_90, %c0_91] : memref<1x8x32xbf16, #tpu.memory_space<vmem>>, vector<1x8x32xbf16>
      %151 = vector.shape_cast %150 : vector<1x8x32xbf16> to vector<8x32xbf16>
      %152 = vector.shape_cast %149 : vector<8x32xbf16> to vector<1x8x32xbf16>
      tpu.vector_store %arg20[%c0_89, %c0_90, %c0_91], %152 {strides = array<i32>} : memref<1x8x32xbf16, #tpu.memory_space<vmem>>, vector<1x8x32xbf16>,
    } else {
    }
    return
  }
  func.func @transform_0(%arg0: i32, %arg1: i32) -> (i32, i32, i32) {
    %c0_i32 = arith.constant 0 : i32
    %c0_i32_0 = arith.constant 0 : i32
    %c0_i32_1 = arith.constant 0 : i32
    return %arg0, %c0_i32, %c0_i32_0 : i32, i32, i32
  }
  func.func @transform_1(%arg0: i32, %arg1: i32) -> (i32, i32, i32) {
    %c0_i32 = arith.constant 0 : i32
    %c0_i32_0 = arith.constant 0 : i32
    %c0_i32_1 = arith.constant 0 : i32
    return %arg0, %c0_i32, %c0_i32_0 : i32, i32, i32
  }
  func.func @transform_2(%arg0: i32, %arg1: i32) -> (i32, i32, i32, i32) {
    %c0_i32 = arith.constant 0 : i32
    %c0_i32_0 = arith.constant 0 : i32
    %c0_i32_1 = arith.constant 0 : i32
    %c0_i32_2 = arith.constant 0 : i32
    return %arg1, %c0_i32, %c0_i32_0, %c0_i32_1 : i32, i32, i32, i32
  }
  func.func @transform_3(%arg0: i32, %arg1: i32) -> (i32, i32, i32, i32) {
    %c0_i32 = arith.constant 0 : i32
    %c0_i32_0 = arith.constant 0 : i32
    %c0_i32_1 = arith.constant 0 : i32
    %c0_i32_2 = arith.constant 0 : i32
    return %arg1, %c0_i32, %c0_i32_0, %c0_i32_1 : i32, i32, i32, i32
  }
  func.func @transform_4(%arg0: i32, %arg1: i32) -> (i32, i32, i32, i32) {
    %c0_i32 = arith.constant 0 : i32
    %c0_i32_0 = arith.constant 0 : i32
    %c0_i32_1 = arith.constant 0 : i32
    %c0_i32_2 = arith.constant 0 : i32
    return %arg1, %c0_i32, %c0_i32_0, %c0_i32_1 : i32, i32, i32, i32
  }
  func.func @transform_5(%arg0: i32, %arg1: i32) -> (i32, i32, i32, i32) {
    %c0_i32 = arith.constant 0 : i32
    %c0_i32_0 = arith.constant 0 : i32
    %c0_i32_1 = arith.constant 0 : i32
    %c0_i32_2 = arith.constant 0 : i32
    return %arg1, %c0_i32, %c0_i32_0, %c0_i32_1 : i32, i32, i32, i32
  }
  func.func @transform_6(%arg0: i32, %arg1: i32) -> (i32, i32, i32, i32) {
    %c0_i32 = arith.constant 0 : i32
    %c0_i32_0 = arith.constant 0 : i32
    %c0_i32_1 = arith.constant 0 : i32
    %c0_i32_2 = arith.constant 0 : i32
    return %arg1, %c0_i32, %c0_i32_0, %c0_i32_1 : i32, i32, i32, i32
  }
  func.func @transform_7(%arg0: i32, %arg1: i32) -> (i32, i32, i32, i32) {
    %c0_i32 = arith.constant 0 : i32
    %c0_i32_0 = arith.constant 0 : i32
    %c0_i32_1 = arith.constant 0 : i32
    %c0_i32_2 = arith.constant 0 : i32
    return %arg1, %c0_i32, %c0_i32_0, %c0_i32_1 : i32, i32, i32, i32
  }
  func.func @transform_8(%arg0: i32, %arg1: i32) -> (i32, i32, i32, i32) {
    %c0_i32 = arith.constant 0 : i32
    %c0_i32_0 = arith.constant 0 : i32
    %c0_i32_1 = arith.constant 0 : i32
    %c0_i32_2 = arith.constant 0 : i32
    return %arg1, %c0_i32, %c0_i32_0, %c0_i32_1 : i32, i32, i32, i32
  }
  func.func @transform_9(%arg0: i32, %arg1: i32) -> (i32, i32, i32) {
    %c0_i32 = arith.constant 0 : i32
    %c0_i32_0 = arith.constant 0 : i32
    %c0_i32_1 = arith.constant 0 : i32
    return %arg1, %c0_i32, %c0_i32_0 : i32, i32, i32
  }
  func.func @transform_10(%arg0: i32, %arg1: i32) -> (i32, i32, i32) {
    %c0_i32 = arith.constant 0 : i32
    %c0_i32_0 = arith.constant 0 : i32
    %c0_i32_1 = arith.constant 0 : i32
    return %arg1, %c0_i32, %c0_i32_0 : i32, i32, i32
  }
  func.func @transform_11(%arg0: i32, %arg1: i32) -> (i32, i32, i32) {
    %c0_i32 = arith.constant 0 : i32
    %c0_i32_0 = arith.constant 0 : i32
    %c0_i32_1 = arith.constant 0 : i32
    return %arg1, %c0_i32, %c0_i32_0 : i32, i32, i32
  }
  func.func @transform_12(%arg0: i32, %arg1: i32) -> (i32, i32, i32) {
    %c0_i32 = arith.constant 0 : i32
    %c0_i32_0 = arith.constant 0 : i32
    %c0_i32_1 = arith.constant 0 : i32
    return %arg1, %c0_i32, %c0_i32_0 : i32, i32, i32
  }
  func.func @transform_13(%arg0: i32, %arg1: i32) -> (i32, i32, i32) {
    %c0_i32 = arith.constant 0 : i32
    %c0_i32_0 = arith.constant 0 : i32
    %c0_i32_1 = arith.constant 0 : i32
    return %arg1, %c0_i32, %c0_i32_0 : i32, i32, i32
  }
  func.func @transform_14(%arg0: i32, %arg1: i32) -> (i32, i32, i32) {
    %c0_i32 = arith.constant 0 : i32
    %c0_i32_0 = arith.constant 0 : i32
    %c0_i32_1 = arith.constant 0 : i32
    return %arg1, %c0_i32, %c0_i32_0 : i32, i32, i32
  }
  func.func @transform_15(%arg0: i32, %arg1: i32) -> (i32, i32, i32) {
    %c0_i32 = arith.constant 0 : i32
    %c0_i32_0 = arith.constant 0 : i32
    %c0_i32_1 = arith.constant 0 : i32
    return %arg1, %c0_i32, %c0_i32_0 : i32, i32, i32
  }
  func.func @transform_16(%arg0: i32, %arg1: i32) -> (i32, i32, i32) {
    %c0_i32 = arith.constant 0 : i32
    %c0_i32_0 = arith.constant 0 : i32
    %c0_i32_1 = arith.constant 0 : i32
    return %arg1, %c0_i32, %c0_i32_0 : i32, i32, i32
  }
  func.func @transform_17(%arg0: i32, %arg1: i32) -> (i32, i32, i32) {
    %c0_i32 = arith.constant 0 : i32
    %c0_i32_0 = arith.constant 0 : i32
    %c0_i32_1 = arith.constant 0 : i32
    return %arg1, %c0_i32, %c0_i32_0 : i32, i32, i32
  }
  func.func @transform_18(%arg0: i32, %arg1: i32) -> (i32, i32, i32) {
    %c0_i32 = arith.constant 0 : i32
    %c0_i32_0 = arith.constant 0 : i32
    %c0_i32_1 = arith.constant 0 : i32
    return %arg0, %c0_i32, %c0_i32_0 : i32, i32, i32
  }
}

</mosaic_0001>

<bundles_post_ra>
// kernel: tpu_custom_call.1
= control target key start
LH: loop header
LB: loop body
LE: loop exit
PB: predicated region body
PF: predicated region fallthrough
CT: control target
= control target key end

     0   :  { %s3940_s0 = inlined_call_operand.vmem [shape: bf16[2,8,32], index: 0, kind: input, shape index: {}]   ;;  %s3941_s1 = inlined_call_operand.vmem [shape: f32[2,1,8], index: 1, kind: input, shape index: {}]   ;;  %s3942_s2 = inlined_call_operand.vmem [shape: bf16[2,4,32,8], index: 2, kind: input, shape index: {}]   ;;  %s3943_s3 = inlined_call_operand.vmem [shape: f32[2,4,1,8], index: 3, kind: input, shape index: {}]   ;;  %s3944_s4 = inlined_call_operand.vmem [shape: bf16[2,4,32,8], index: 4, kind: input, shape index: {}]   ;;  %s3945_s5 = inlined_call_operand.vmem [shape: f32[2,4,1,8], index: 5, kind: input, shape index: {}]   ;;  %s3946_s6 = inlined_call_operand.vmem [shape: bf16[2,4,32,8], index: 6, kind: input, shape index: {}]   ;;  %s3947_s7 = inlined_call_operand.vmem [shape: f32[2,4,1,8], index: 7, kind: input, shape index: {}]   ;;  %s3948_s8 = inlined_call_operand.vmem [shape: bf16[2,4,8,32], index: 8, kind: input, shape index: {}]   ;;  %s3949_s9 = inlined_call_operand.vmem [shape: f32[2,1,32], index: 9, kind: input, shape index: {}]   ;;  %s3950_s10 = inlined_call_operand.vmem [shape: f32[2,1,32], index: 10, kind: input, shape index: {}]   ;;  %s3951_s11 = inlined_call_operand.vmem [shape: f32[2,1,32], index: 11, kind: input, shape index: {}]   ;;  %s3952_s12 = inlined_call_operand.vmem [shape: bf16[2,32,64], index: 12, kind: input, shape index: {}]   ;;  %s3953_s13 = inlined_call_operand.vmem [shape: f32[2,1,64], index: 13, kind: input, shape index: {}]   ;;  %s3954_s14 = inlined_call_operand.vmem [shape: bf16[2,64,32], index: 14, kind: input, shape index: {}]   ;;  %s3955_s15 = inlined_call_operand.vmem [shape: f32[2,1,32], index: 15, kind: input, shape index: {}]   ;;  %s3956_s16 = inlined_call_operand.vmem [shape: f32[2,1,32], index: 16, kind: input, shape index: {}]   ;;  %s3957_s17 = inlined_call_operand.vmem [shape: f32[2,1,32], index: 17, kind: input, shape index: {}]   ;;  %s3958_s18 = inlined_call_operand.hbm [shape: bf16[2,8,32], index: 18, kind: output, shape index: {}]  }
   0x1   :  { %3976 = sst [smem:[#allocation21_spill]] %s3940_s0 }
   0x2   :  { %3977 = sst [smem:[#allocation22_spill]] %s3941_s1 }
   0x3   :  { %3978 = sst [smem:[#allocation23_spill]] %s3942_s2 }
   0x4   :  { %3979 = sst [smem:[#allocation24_spill]] %s3943_s3 }
   0x5   :  { %3980 = sst [smem:[#allocation25_spill]] %s3944_s4 }
   0x6   :  { %3981 = sst [smem:[#allocation26_spill]] %s3945_s5 }
   0x7   :  { %3982 = sst [smem:[#allocation27_spill]] %s3946_s6 }
   0x8   :  { %3983 = sst [smem:[#allocation28_spill]] %s3947_s7 }
   0x9   :  { %3984 = sst [smem:[#allocation29_spill]] %s3948_s8 }
   0xa   :  { %3985 = sst [smem:[#allocation30_spill]] %s3949_s9 }
   0xb   :  { %3986 = sst [smem:[#allocation31_spill]] %s3950_s10 }
   0xc   :  { %3987 = sst [smem:[#allocation32_spill]] %s3951_s11 }
   0xd   :  { %3988 = sst [smem:[#allocation33_spill]] %s3952_s12 }
   0xe   :  { %3989 = sst [smem:[#allocation34_spill]] %s3954_s14 }
   0xf   :  { %3990 = sst [smem:[#allocation35_spill]] %s3955_s15 }
  0x10   :  { %3991 = sst [smem:[#allocation36_spill]] %s3956_s16 }
  0x11   :  { %3992 = sst [smem:[#allocation37_spill]] %s3957_s17 }
  0x12   :  { %3993 = sst [smem:[#allocation38_spill]] %s3958_s18 }
  0x13   :  { %23 = vsyncpa [#allocation4], 0 }
  0x14   :  { %25 = vsyncpa [#allocation4 + $0x1], 0  ;;  %s3460_s27 = smov 0   ;;  %s3462_s28 = smov 0  }
  0x15   :  { %s3464_s29 = smov 0   ;;  %s3466_s30 = smov 0  }
  0x16   :  { %s3468_s0 = smov 0   ;;  %s3470_s19 = smov 0  }
  0x17   :  { %s3472_s1 = smov 0   ;;  %s3474_s20 = smov 0  }
  0x18 LB: > { %3994 = sst [smem:[#allocation6_spill]] %s3332_s27  ;;  %s2776_s21 = sadd.s32 4294967295, %s3360_s20   ;;  %s3360_s20 = sphi %s3474_s20, %s31_s20   ;;  %s3356_s1 = sphi %s3472_s1, %s4058_s1   ;;  %s3352_s19 = sphi %s3470_s19, %s4057_s19   ;;  %s3348_s0 = sphi %s3468_s0, %s4056_s0   ;;  %s3344_s30 = sphi %s3466_s30, %s4055_s30   ;;  %s3340_s29 = sphi %s3464_s29, %s4054_s29   ;;  %s3336_s28 = sphi %s3462_s28, %s4053_s28   ;;  %s3332_s27 = sphi %s3460_s27, %s4052_s27  }
  0x19   : > { %3995 = sst [smem:[#allocation7_spill]] %s3336_s28  ;;  %s2777_s22 = sadd.s32 4294967294, %s3360_s20  }
  0x1a   : > { %3996 = sst [smem:[#allocation8_spill]] %s3340_s29  ;;  %s40_s2 = sadd.s32 1, %s3352_s19 }
  0x1b   : > { %3997 = sst [smem:[#allocation9_spill]] %s3344_s30  ;;  %p41_p0 = scmp.ge.s32.totalorder %s40_s2, 2 }
  0x1c   : > { %3998 = sst [smem:[#allocation10_spill]] %s3348_s0  ;;  %s43_s23 = sadd.s32 1, %s3356_s1 }
  0x1d   : > { %3999 = sst [smem:[#allocation11_spill]] %s3352_s19  ;;  %p528_p1 = scmp.ne.s32.totalorder %s3340_s29, %s3336_s28 }
  0x1e   : > { %4000 = sst [smem:[#allocation12_spill]] %s3356_s1  ;;  %p529_p2 = scmp.eq.s32.totalorder %s2776_s21, 3 }
  0x1f   : > { %4001 = sst [smem:[#allocation13_spill]] %s3360_s20  ;;  %s4060_s2 = smov (%p41_p0, %s40_s2), 0 }
  0x20   : > { %4002 = sst [smem:[#allocation14_spill]] %s4060_s2  ;;  %s4062_s23 = smov (!%p41_p0, %s43_s23), %s3356_s1 }
  0x21   : > { %p3509_p3 = por %p529_p2, %p528_p1  ;;  %p534_p4 = scmp.ne.s32.totalorder %s3336_s28, %s3332_s27 }
  0x22   : > { %p45_p5 = scmp.ge.s32.totalorder %s4062_s23, 2  ;;  %p535_p6 = scmp.eq.s32.totalorder %s2777_s22, 3 }
  0x23   : > { %s4003_s24 = scalar_select %p3509_p3, 1, 0 }
  0x24   : > { %p2780_p7 = scmp.ge.s32.totalorder %s3360_s20, 1  ;;  %p677_p8 = scmp.lt.s32.totalorder %s3360_s20, 5 }
  0x25   : > { %4004 = sst [smem:[#allocation15_spill]] %s4003_s24  ;;  %s4064_s23 = smov (%p45_p5, %s4062_s23), 0 }
  0x26   : > { %4005 = sst [smem:[#allocation16_spill]] %s4064_s23  ;;  %p3519_p9 = por %p535_p6, %p534_p4 }
  0x27   : > { %p678_p10 = pnand %p2780_p7, %p677_p8  ;;  %s515_s26 = ssub.s32 %s3356_s1, %s4064_s23 }
  0x28   : > { %s4006_s25 = scalar_select %p3519_p9, 1, 0 }
  0x29   : > { %s518_s21 = sadd.s32 1, %s3340_s29  ;;  %p516_p11 = scmp.eq.s32.totalorder %s515_s26, 0 }
  0x2a   : > { %4007 = sst [smem:[#allocation17_spill]] %s4006_s25  ;;  %681 = sbr.rel (%p678_p10) target bundleno = 2264 (0x8d8), region = 92 }
  0x2b   : > { %s3527_s2 = scalar_select %p516_p11, %s3340_s29, %s518_s21  }
  0x2d   : > { %4008 = sst [smem:[#allocation18_spill]] %s3527_s2 }
  0x31   : > { %s3964_s22 = sand.u32 1, %s3336_s28   ;;  %p796_p12 = scmp.lt.s32.totalorder %s3348_s0, 1 }
  0x32   : > { %s3533_s19 = sshll.u32 %s3964_s22, 2  ;;  %p803_p13 = scmp.lt.s32.totalorder %s3344_s30, 1 }
  0x33   : > { %s3537_s25 = scalar_select %p796_p12, %s3348_s0, 1 }
  0x34   : > { %s3540_s26 = scalar_select %p803_p13, %s3344_s30, 1 }
  0x35   : > { %4009 = sst [smem:[#allocation19_spill]] %s3537_s25  ;;  %s2782_s21 = sshll.u32 %s3537_s25, 2 }
  0x36   : > { %s4011_s20 = sld [smem:[#allocation21_spill]]  ;;  %s2879_s24 = sshll.u32 %s3540_s26, 6 }
  0x37   : > { %s4012_s30 = sld [smem:[#allocation23_spill]]  ;;  %s2785_s16 = sshll.u32 %s3540_s26, 2 }
  0x38   : > { %s4013_s3 = sld [smem:[#allocation24_spill]]  ;;  %s4015_s4 = sld [smem:[#allocation25_spill]] }
  0x39   : > { %s4016_s5 = sld [smem:[#allocation26_spill]]  ;;  %s4017_s6 = sld [smem:[#allocation27_spill]] }
  0x3a   : > { %s4018_s7 = sld [smem:[#allocation28_spill]]  ;;  %s2882_s2 = sshll.u32 %s3540_s26, 4 }
  0x3b   : > { %s4019_s8 = sld [smem:[#allocation29_spill]]  ;;  %s4023_s12 = sld [smem:[#allocation33_spill]] }
  0x3c   : > { %s799_s18 = scalar_lea.vmem %s4011_s20, %s2782_s21  ;;  %s4026_s14 = sld [smem:[#allocation36_spill]] }
  0x3d   : > { %s3554_s17 = scalar_lea.vmem %s4012_s30, %s2879_s24  ;;  %s4028_s23 = sld [smem:[#allocation9_spill]] }
  0x3e   : > { %s3560_s1 = scalar_lea.vmem %s4013_s3, %s2785_s16  ;;  %s3565_s27 = scalar_lea.vmem %s4015_s4, %s2879_s24 }
  0x3f   : > { %4014 = sst [smem:[#allocation20_spill]] %s3560_s1  ;;  %s3570_s28 = scalar_lea.vmem %s4016_s5, %s2785_s16 }
  0x40   : > { %s3575_s21 = scalar_lea.vmem %s4017_s6, %s2879_s24  ;;  %s3580_s29 = scalar_lea.vmem %s4018_s7, %s2785_s16 }
  0x41   : > { %s3586_s4 = scalar_lea.vmem %s4019_s8, %s2882_s2  ;;  %s3603_s6 = scalar_lea.vmem %s4023_s12, %s2882_s2 }
  0x42   : > { %s851_s7 = scalar_lea.vmem %s3953_s13, %s3540_s26  ;;  %s2884_s8 = sshll.u32 %s3540_s26, 5 }
  0x43   : > { %s4024_s5 = sld [smem:[#allocation35_spill]]  ;;  %s4025_s24 = sld [smem:[#allocation34_spill]] }
  0x44   : > { %s862_s16 = scalar_lea.vmem %s4026_s14, %s3540_s26  ;;  %s4027_s12 = sld [smem:[#allocation37_spill]] }
  0x45   : > { %s795_s3 = scalar_lea.vmem [#allocation3], %s3533_s19  ;;  %p2798_p0 = scmp.ne.s32.totalorder %s4028_s23, 0 }
  0x46   : > { %v871_v0 = vld [vmem:[%s799_s18] sm:$0xf] (!%p2798_p0)  ;;  %vm873_vm0 = vcmask (!%p2798_p0), 261120  }
  0x47   : > { %870 = sbr.rel (%p2798_p0) target bundleno = 78 (0x4e), region = 96  ;;  %v872_v1 = vunpack.c.l.bf16 (!%p2798_p0), %v871_v0 }
  0x49   : > { %s859_s9 = scalar_lea.vmem %s4024_s5, %s3540_s26  ;;  %s3617_s10 = scalar_lea.vmem %s4025_s24, %s2884_s8  ;;  %874 = vst.msk [vmem:[#allocation2] sm:$0xff] (!%p2798_p0), %vm873_vm0, %v872_v1 }
  0x4a   : > { %s865_s11 = scalar_lea.vmem %s4027_s12, %s3540_s26 }
  0x4e PF: > { %v3214_v2 = vld [vmem:[%s3554_s17] sm:$0xff]   ;;  %v3362_v3 = vmov 0.0   ;;  %v3215_v4 = vld [vmem:[%s3554_s17 + $0x10] sm:$0xff]   ;;  %v3216_v5 = vld [vmem:[%s3554_s17 + $0x8] sm:$0xff]   ;;  %vm3363_vm1 = vmmov 0   ;;  %vm933_vm2 = vcmask 261120  }
  0x4f   : > { %2953 = vmatprep.subr.bf16.mxu0 %v3362_v3  ;;  %2961 = vmatprep.subr.bf16.mxu1 %v3362_v3  ;;  %v3217_v6 = vld [vmem:[%s3554_s17 + $0x18] sm:$0xff]   ;;  %v3218_v9 = vld [vmem:[%s3554_s17 + $0x20] sm:$0xff]   ;;  %v3219_v10 = vld [vmem:[%s3554_s17 + $0x30] sm:$0xff]   ;;  %s4029_s5 = sld [smem:[#allocation20_spill]]  ;;  %vm1658_vm3 = vcmask 64512   ;;  %vm1890_vm4 = vcmask 1043456  }
  0x50   : > { %2954 = vmatpush3.bf16.msra.mxu0 %v3214_v2  ;;  %2957 = vmatprep.mubr.msk.bf16.mxu0 %vm3363_vm1, %v3362_v3  ;;  %v3641_v7 = vld [vmem:[#allocation2] sm:$0xff]  ;;  %v3220_v11 = vld [vmem:[%s3554_s17 + $0x28] sm:$0xff]   ;;  %v3221_v12 = vld [vmem:[%s3554_s17 + $0x38] sm:$0xff]   ;;  %s4030_s8 = sld [smem:[#allocation19_spill]]  ;;  %s4031_s18 = sld [smem:[#allocation22_spill]]  ;;  %vm2430_vm5 = vcmask 523264  }
  0x51   : > { %2962 = vmatpush3.bf16.msra.mxu1 %v3215_v4  ;;  %2955 = vmatprep.subr.bf16.mxu0 %v3362_v3  ;;  %v3645_v8 = vpack.c.bf16 %v3641_v7, %v3641_v7  ;;  %v3222_v13 = vld [vmem:[%s3565_s27] sm:$0xff]   ;;  %v3223_v14 = vld [vmem:[%s3565_s27 + $0x10] sm:$0xff]   ;;  %v3224_v15 = vld [vmem:[%s3565_s27 + $0x8] sm:$0xff]   ;;  %s4035_s20 = sld [smem:[#allocation31_spill]] }
  0x52   : > { %2963 = vmatprep.subr.bf16.mxu1 %v3362_v3  ;;  %2965 = vmatprep.mubr.msk.bf16.mxu1 %vm3363_vm1, %v3362_v3  ;;  %v3225_v16 = vld [vmem:[%s3565_s27 + $0x18] sm:$0xff]   ;;  %v3226_v17 = vld [vmem:[%s3565_s27 + $0x20] sm:$0xff]   ;;  %v3227_v18 = vld [vmem:[%s3565_s27 + $0x30] sm:$0xff]  }
  0x53   : > { %v3228_v19 = vld [vmem:[%s3565_s27 + $0x28] sm:$0xff]   ;;  %v3229_v20 = vld [vmem:[%s3565_s27 + $0x38] sm:$0xff]   ;;  %v3230_v21 = vld [vmem:[%s3575_s21] sm:$0xff]  }
  0x54   : > { %2956 = vmatpush3.bf16.msra.mxu0 %v3216_v5  ;;  %v3231_v22 = vld [vmem:[%s3575_s21 + $0x10] sm:$0xff]   ;;  %v3232_v23 = vld [vmem:[%s3575_s21 + $0x8] sm:$0xff]   ;;  %v3233_v24 = vld [vmem:[%s3575_s21 + $0x18] sm:$0xff]  }
  0x55   : > { %2964 = vmatpush3.bf16.msra.mxu1 %v3217_v6  ;;  %2969 = vmatprep.subr.bf16.mxu0 %v3362_v3  ;;  %v3234_v25 = vld [vmem:[%s3575_s21 + $0x20] sm:$0xff]   ;;  %v3235_v26 = vld [vmem:[%s3575_s21 + $0x30] sm:$0xff]   ;;  %v3236_v27 = vld [vmem:[%s3575_s21 + $0x28] sm:$0xff]  }
  0x56   : > { %2977 = vmatprep.subr.bf16.mxu1 %v3362_v3  ;;  %v3237_v28 = vld [vmem:[%s3575_s21 + $0x38] sm:$0xff]   ;;  %v2815_v45 = vld [vmem:[%s3570_s28] ss:$0 sm:$0xff]  ;;  %v2816_v46 = vld [vmem:[%s3570_s28 + $0x1] ss:$0 sm:$0xff]  ;;  %s4032_s27 = scalar_lea.vmem %s4031_s18, %s4030_s8  ;;  %s4042_s18 = sld [smem:[#allocation9_spill]] }
  0x57   : > { %2958 = vmatmul.mubr.msk.bf16.vlgmr.msra.gmra.mrb[0].mxu0 %vm933_vm2, %v3645_v8  ;;  %v2799_v57 = vld [vmem:[%s4029_s5] ss:$0 sm:$0xff]  ;;  %v2800_v60 = vld [vmem:[%s4029_s5 + $0x1] ss:$0 sm:$0xff]  ;;  %v2817_v63 = vld [vmem:[%s3570_s28 + $0x2] ss:$0 sm:$0xff]  ;;  %s4036_s22 = scalar_lea.vmem %s4035_s20, %s3540_s26 }
  0x58   : > { %2966 = vmatmul.mubr.msk.bf16.vlgmr.msra.gmra.mrb[0].mxu1 %vm933_vm2, %v3645_v8  ;;  %2970 = vmatpush3.bf16.msra.mxu0 %v3218_v9  ;;  %v2818_v1 = vld [vmem:[%s3570_s28 + $0x3] ss:$0 sm:$0xff]  ;;  %s4033_s28 = sld [smem:[#allocation30_spill]] }
  0x59   : > { %2978 = vmatpush3.bf16.msra.mxu1 %v3219_v10  ;;  %2971 = vmatprep.subr.bf16.mxu0 %v3362_v3 }
  0x5a   : > { %2979 = vmatprep.subr.bf16.mxu1 %v3362_v3  ;;  %2973 = vmatprep.mubr.msk.bf16.mxu0 %vm3363_vm1, %v3362_v3 }
  0x5b   : > { %2981 = vmatprep.mubr.msk.bf16.mxu1 %vm3363_vm1, %v3362_v3 }
  0x5c   : > { %2972 = vmatpush3.bf16.msra.mxu0 %v3220_v11  ;;  %p2874_p1 = scmp.ne.s32.totalorder %s4042_s18, 1 }
  0x5d   : > { %2980 = vmatpush3.bf16.msra.mxu1 %v3221_v12  ;;  %2985 = vmatprep.subr.bf16.mxu0 %v3362_v3  ;;  %vm2510_vm6 = vcmask (!%p2874_p1), 257024  }
  0x5e   : > { %2993 = vmatprep.subr.bf16.mxu1 %v3362_v3  ;;  %s4034_s21 = scalar_lea.vmem %s4033_s28, %s3540_s26 }
  0x5f   : > { %2974 = vmatmul.mubr.msk.bf16.vlgmr.msra.gmra.mrb[4].mxu0 %vm933_vm2, %v3645_v8 }
  0x60   : > { %2982 = vmatmul.mubr.msk.bf16.vlgmr.msra.gmra.mrb[4].mxu1 %vm933_vm2, %v3645_v8  ;;  %2986 = vmatpush3.bf16.msra.mxu0 %v3222_v13 }
  0x61   : > { %2994 = vmatpush3.bf16.msra.mxu1 %v3223_v14  ;;  %2987 = vmatprep.subr.bf16.mxu0 %v3362_v3 }
  0x62   : > { %2995 = vmatprep.subr.bf16.mxu1 %v3362_v3  ;;  %2989 = vmatprep.mubr.msk.bf16.mxu0 %vm3363_vm1, %v3362_v3 }
  0x63   : > { %2997 = vmatprep.mubr.msk.bf16.mxu1 %vm3363_vm1, %v3362_v3 }
  0x64   : > { %2988 = vmatpush3.bf16.msra.mxu0 %v3224_v15 }
  0x65   : > { %2996 = vmatpush3.bf16.msra.mxu1 %v3225_v16  ;;  %3001 = vmatprep.subr.bf16.mxu0 %v3362_v3 }
  0x66   : > { %3009 = vmatprep.subr.bf16.mxu1 %v3362_v3 }
  0x67   : > { %2990 = vmatmul.mubr.msk.bf16.vlgmr.msra.gmra.mrb[8].mxu0 %vm933_vm2, %v3645_v8 }
  0x68   : > { %2998 = vmatmul.mubr.msk.bf16.vlgmr.msra.gmra.mrb[8].mxu1 %vm933_vm2, %v3645_v8  ;;  %3002 = vmatpush3.bf16.msra.mxu0 %v3226_v17  ;;  %v2801_v17 = vld [vmem:[%s4029_s5 + $0x2] ss:$0 sm:$0xff] }
  0x69   : > { %3010 = vmatpush3.bf16.msra.mxu1 %v3227_v18  ;;  %3003 = vmatprep.subr.bf16.mxu0 %v3362_v3 }
  0x6a   : > { %3011 = vmatprep.subr.bf16.mxu1 %v3362_v3  ;;  %3005 = vmatprep.mubr.msk.bf16.mxu0 %vm3363_vm1, %v3362_v3 }
  0x6b   : > { %3013 = vmatprep.mubr.msk.bf16.mxu1 %vm3363_vm1, %v3362_v3 }
  0x6c   : > { %3004 = vmatpush3.bf16.msra.mxu0 %v3228_v19 }
  0x6d   : > { %3012 = vmatpush3.bf16.msra.mxu1 %v3229_v20  ;;  %3017 = vmatprep.subr.bf16.mxu0 %v3362_v3  ;;  %v2802_v20 = vld [vmem:[%s4029_s5 + $0x3] ss:$0 sm:$0xff] }
  0x6e   : > { %3025 = vmatprep.subr.bf16.mxu1 %v3362_v3 }
  0x6f   : > { %3006 = vmatmul.mubr.msk.bf16.vlgmr.msra.gmra.mrb[12].mxu0 %vm933_vm2, %v3645_v8 }
  0x70   : > { %3014 = vmatmul.mubr.msk.bf16.vlgmr.msra.gmra.mrb[12].mxu1 %vm933_vm2, %v3645_v8  ;;  %3018 = vmatpush3.bf16.msra.mxu0 %v3230_v21 }
  0x71   : > { %3019 = vmatprep.subr.bf16.mxu0 %v3362_v3  ;;  %3021 = vmatprep.mubr.msk.bf16.mxu0 %vm3363_vm1, %v3362_v3 }
  0x72   : > { %3029 = vmatprep.mubr.msk.bf16.mxu1 %vm3363_vm1, %v3362_v3  ;;  %3026 = vmatpush3.bf16.msra.mxu1 %v3231_v22 }
  0x73   : > { %3027 = vmatprep.subr.bf16.mxu1 %v3362_v3 }
  0x74   : > { %3020 = vmatpush3.bf16.msra.mxu0 %v3232_v23 }
  0x75   : > { %3033 = vmatprep.subr.bf16.mxu0 %v3362_v3 }
  0x76   : > { %3028 = vmatpush3.bf16.msra.mxu1 %v3233_v24 }
  0x77   : > { %3022 = vmatmul.mubr.msk.bf16.vlgmr.msra.gmra.mrb[16].mxu0 %vm933_vm2, %v3645_v8  ;;  %3041 = vmatprep.subr.bf16.mxu1 %v3362_v3 }
  0x78   : > { %3037 = vmatprep.mubr.msk.bf16.mxu0 %vm3363_vm1, %v3362_v3  ;;  %3034 = vmatpush3.bf16.msra.mxu0 %v3234_v25 }
  0x79   : > { %3030 = vmatmul.mubr.msk.bf16.vlgmr.msra.gmra.mrb[16].mxu1 %vm933_vm2, %v3645_v8  ;;  %3035 = vmatprep.subr.bf16.mxu0 %v3362_v3 }
  0x7a   : > { %3042 = vmatpush3.bf16.msra.mxu1 %v3235_v26  ;;  %3045 = vmatprep.mubr.msk.bf16.mxu1 %vm3363_vm1, %v3362_v3 }
  0x7b   : > { %3043 = vmatprep.subr.bf16.mxu1 %v3362_v3 }
  0x7c   : > { %3036 = vmatpush3.bf16.msra.mxu0 %v3236_v27  ;;  %v2831_v27 = vld [vmem:[%s3580_s29] ss:$0 sm:$0xff] }
  0x7d   : > { %3049 = vmatprep.subr.bf16.mxu0 %v3362_v3 }
  0x7e   : > { %3044 = vmatpush3.bf16.msra.mxu1 %v3237_v28 }
  0x7f   : > { %3055 = vmatprep.subr.bf16.mxu1 %v3362_v3  ;;  %3038 = vmatmul.mubr.msk.bf16.vlgmr.msra.gmra.mrb[20].mxu0 %vm933_vm2, %v3645_v8 }
  0x80   : > { %3051 = vmatprep.mubr.msk.bf16.mxu0 %vm3363_vm1, %v3362_v3 }
  0x81   : > { %3046 = vmatmul.mubr.msk.bf16.vlgmr.msra.gmra.mrb[20].mxu1 %vm933_vm2, %v3645_v8 }
  0x82   : > { %3057 = vmatprep.mubr.msk.bf16.mxu1 %vm3363_vm1, %v3362_v3 }
 0x12a   : > { %v971_v29 = vpop.f32.mrb[0].mxu0 }
 0x12b   : > { %v2959_v30 = vpop.f32.mrb[1].mxu0  ;;  %v1023_v31 = vpop.f32.mrb[0].mxu1  ;;  %v972_v0 = vadd.f32 %v2799_v57, %v971_v29  ;;  %v2832_v29 = vld [vmem:[%s3580_s29 + $0x1] ss:$0 sm:$0xff] }
 0x12c   : > { %v974_v32 = vpop.f32.mrb[2].mxu0  ;;  %v2967_v33 = vpop.f32.mrb[1].mxu1  ;;  %v1024_v2 = vadd.f32 %v2800_v60, %v1023_v31 }
 0x12d   : > { %v2960_v34 = vpop.f32.mrb[3].mxu0  ;;  %v1026_v35 = vpop.f32.mrb[2].mxu1  ;;  %v1133_v12 = vpack.c.bf16 %v972_v0, %v972_v0 }
 0x12e   : > { %v2968_v36 = vpop.f32.mrb[3].mxu1  ;;  %v1134_v16 = vpack.c.bf16 %v1024_v2, %v1024_v2 }
 0x132   : > { %v1075_v37 = vpop.f32.mrb[4].mxu0 }
 0x133   : > { %v2975_v38 = vpop.f32.mrb[5].mxu0  ;;  %v1127_v39 = vpop.f32.mrb[4].mxu1  ;;  %v1076_v23 = vadd.f32 %v2801_v17, %v1075_v37 }
 0x134   : > { %v1078_v40 = vpop.f32.mrb[6].mxu0  ;;  %v2983_v41 = vpop.f32.mrb[5].mxu1  ;;  %v1128_v24 = vadd.f32 %v2802_v20, %v1127_v39 }
 0x135   : > { %v2976_v42 = vpop.f32.mrb[7].mxu0  ;;  %v1130_v43 = vpop.f32.mrb[6].mxu1  ;;  %v1135_v25 = vpack.c.bf16 %v1076_v23, %v1076_v23 }
 0x136   : > { %v2984_v44 = vpop.f32.mrb[7].mxu1  ;;  %v1136_v26 = vpack.c.bf16 %v1128_v24, %v1128_v24 }
 0x13a   : > { %v1227_v47 = vpop.f32.mrb[8].mxu0 }
 0x13b   : > { %v1228_v48 = vadd.f32 %v2815_v45, %v1227_v47  ;;  %v1279_v49 = vpop.f32.mrb[8].mxu1  ;;  %v2991_v50 = vpop.f32.mrb[9].mxu0 }
 0x13c   : > { %v1280_v51 = vadd.f32 %v2816_v46, %v1279_v49  ;;  %v1230_v52 = vpop.f32.mrb[10].mxu0  ;;  %v2999_v53 = vpop.f32.mrb[9].mxu1 }
 0x13d   : > { %v1389_v54 = vpack.c.bf16 %v1228_v48, %v1228_v48  ;;  %v2992_v55 = vpop.f32.mrb[11].mxu0  ;;  %v1282_v56 = vpop.f32.mrb[10].mxu1  ;;  %v1649_v52 = vld [vmem:[%s4032_s27] sm:$0x1] }
 0x13e   : > { %v1390_v58 = vpack.c.bf16 %v1280_v51, %v1280_v51  ;;  %v3000_v59 = vpop.f32.mrb[11].mxu1  ;;  %v1653_v51 = vlaneseq  ;;  %v1650_v53 = vsub.f32 1.0, %v1649_v52  ;;  %v2080_v52 = vld [vmem:[%s3586_s4] sm:$0xf] }
 0x13f   : > { %v1663_v61 = vsel %vm1658_vm3, %v1389_v54, 0 }
 0x140   : > { %v1709_v62 = vsel %vm1658_vm3, %v1390_v58, 0  ;;  %3050 = vmatpush3.bf16.xpose.msra.mxu0 %v1663_v61  ;;  %v1654_v54 = vshrl.u32 %v1653_v51, 7  ;;  %v1651_v55 = vmul.f32 -1e+09, %v1650_v53  ;;  %v2088_v53 = vsel %vm1890_vm4, %v2080_v52, 0 }
 0x141   : > { %3056 = vmatpush3.bf16.xpose.msra.mxu1 %v1709_v62  ;;  %3061 = vmatprep.subr.bf16.mxu0 %v3362_v3 }
 0x142   : > { %v1331_v4 = vpop.f32.mrb[12].mxu0  ;;  %3067 = vmatprep.subr.bf16.mxu1 %v3362_v3  ;;  %v1655_v56 = vsub.s32 0, %v1654_v54  ;;  %v2081_v54 = vld [vmem:[%s3586_s4 + $0x4] sm:$0xf] }
 0x143   : > { %v1332_v5 = vadd.f32 %v2817_v63, %v1331_v4  ;;  %v1383_v6 = vpop.f32.mrb[12].mxu1  ;;  %v3007_v8 = vpop.f32.mrb[13].mxu0 }
 0x144   : > { %v1384_v9 = vadd.f32 %v2818_v1, %v1383_v6  ;;  %v1334_v10 = vpop.f32.mrb[14].mxu0  ;;  %v3015_v11 = vpop.f32.mrb[13].mxu1  ;;  %v1656_v57 = vrot.slane %v1651_v55, %v1655_v56  ;;  %v2134_v55 = vsel %vm1890_vm4, %v2081_v54, 0 }
 0x145   : > { %v1391_v13 = vpack.c.bf16 %v1332_v5, %v1332_v5  ;;  %v3008_v14 = vpop.f32.mrb[15].mxu0  ;;  %v1386_v15 = vpop.f32.mrb[14].mxu1 }
 0x146   : > { %v1392_v18 = vpack.c.bf16 %v1384_v9, %v1384_v9  ;;  %v3016_v19 = vpop.f32.mrb[15].mxu1 }
 0x147   : > { %v1755_v21 = vsel %vm1658_vm3, %v1391_v13, 0  ;;  %3052 = vmatmul.mubr.msk.bf16.vlgmr.msra.gmra.mrb[24].mxu0 %vm1658_vm3, %v1133_v12 }
 0x148   : > { %v1801_v22 = vsel %vm1658_vm3, %v1392_v18, 0  ;;  %3058 = vmatmul.mubr.msk.bf16.vlgmr.msra.gmra.mrb[24].mxu1 %vm1658_vm3, %v1134_v16  ;;  %3062 = vmatpush3.bf16.xpose.msra.mxu0 %v1755_v21 }
 0x149   : > { %3068 = vmatpush3.bf16.xpose.msra.mxu1 %v1801_v22  ;;  %3063 = vmatprep.mubr.msk.bf16.mxu0 %vm3363_vm1, %v3362_v3 }
 0x14a   : > { %3069 = vmatprep.mubr.msk.bf16.mxu1 %vm3363_vm1, %v3362_v3  ;;  %3073 = vmatprep.subr.bf16.mxu0 %v3362_v3  ;;  %v1483_v28 = vpop.f32.mrb[16].mxu0 }
 0x14b   : > { %3079 = vmatprep.subr.bf16.mxu1 %v3362_v3  ;;  %v1484_v30 = vadd.f32 %v2831_v27, %v1483_v28  ;;  %v3023_v31 = vpop.f32.mrb[17].mxu0 }
 0x14c   : > { %v1486_v32 = vpop.f32.mrb[18].mxu0  ;;  %v1535_v33 = vpop.f32.mrb[16].mxu1 }
 0x14d   : > { %v1645_v34 = vpack.c.bf16 %v1484_v30, %v1484_v30  ;;  %v3024_v35 = vpop.f32.mrb[19].mxu0  ;;  %v1536_v36 = vadd.f32 %v2832_v29, %v1535_v33  ;;  %v3031_v37 = vpop.f32.mrb[17].mxu1  ;;  %v2834_v30 = vld [vmem:[%s3580_s29 + $0x3] ss:$0 sm:$0xff] }
 0x14e   : > { %v1538_v38 = vpop.f32.mrb[18].mxu1 }
 0x14f   : > { %3064 = vmatmul.mubr.msk.bf16.vlgmr.msra.gmra.mrb[28].mxu0 %vm1658_vm3, %v1135_v25  ;;  %v1892_v39 = vsel %vm1890_vm4, %v1645_v34, 0  ;;  %v1646_v40 = vpack.c.bf16 %v1536_v36, %v1536_v36  ;;  %v3032_v41 = vpop.f32.mrb[19].mxu1  ;;  %v2833_v25 = vld [vmem:[%s3580_s29 + $0x2] ss:$0 sm:$0xff] }
 0x150   : > { %3070 = vmatmul.mubr.msk.bf16.vlgmr.msra.gmra.mrb[28].mxu1 %vm1658_vm3, %v1136_v26  ;;  %3075 = vmatprep.mubr.msk.bf16.mxu0 %vm3363_vm1, %v3362_v3 }
 0x151   : > { %3081 = vmatprep.mubr.msk.bf16.mxu1 %vm3363_vm1, %v3362_v3  ;;  %3074 = vmatpush3.bf16.msra.mxu0 %v1892_v39  ;;  %v1938_v42 = vsel %vm1890_vm4, %v1646_v40, 0 }
 0x152   : > { %3085 = vmatprep.subr.bf16.mxu0 %v3362_v3  ;;  %3080 = vmatpush3.bf16.msra.mxu1 %v1938_v42  ;;  %v1587_v43 = vpop.f32.mrb[20].mxu0 }
 0x153   : > { %3091 = vmatprep.subr.bf16.mxu1 %v3362_v3  ;;  %v3039_v45 = vpop.f32.mrb[21].mxu0  ;;  %v1588_v29 = vadd.f32 %v2833_v25, %v1587_v43 }
 0x154   : > { %v1639_v44 = vpop.f32.mrb[20].mxu1  ;;  %v1590_v47 = vpop.f32.mrb[22].mxu0 }
 0x155   : > { %v3047_v46 = vpop.f32.mrb[21].mxu1  ;;  %v3040_v49 = vpop.f32.mrb[23].mxu0  ;;  %v1647_v34 = vpack.c.bf16 %v1588_v29, %v1588_v29  ;;  %v1640_v35 = vadd.f32 %v2834_v30, %v1639_v44 }
 0x156   : > { %v1642_v48 = vpop.f32.mrb[22].mxu1 }
 0x157   : > { %v3048_v50 = vpop.f32.mrb[23].mxu1  ;;  %v1984_v40 = vsel %vm1890_vm4, %v1647_v34, 0  ;;  %v1648_v41 = vpack.c.bf16 %v1640_v35, %v1640_v35 }
 0x159   : > { %v2030_v45 = vsel %vm1890_vm4, %v1648_v41, 0 }
 0x21a   : > { %v1699_v58 = vpop.f32.mrb[24].mxu0 }
 0x21b   : > { %v1700_v59 = vadd.f32 %v1699_v58, %v1656_v57  ;;  %v1745_v60 = vpop.f32.mrb[24].mxu1  ;;  %v3053_v61 = vpop.f32.mrb[25].mxu0 }
 0x21c   : > { %v3059_v62 = vpop.f32.mrb[25].mxu1  ;;  %v1702_v63 = vpop.f32.mrb[26].mxu0  ;;  %v1746_v0 = vadd.f32 %v1745_v60, %v1656_v57 }
 0x21d   : > { %v1748_v1 = vpop.f32.mrb[26].mxu1  ;;  %v3054_v2 = vpop.f32.mrb[27].mxu0  ;;  %v1843_v4 = vsel %vm1658_vm3, %v1700_v59, -inf  ;;  %v2082_v62 = vld [vmem:[%s3586_s4 + $0x8] sm:$0xf] }
 0x21e   : > { %v3060_v5 = vpop.f32.mrb[27].mxu1  ;;  %1844 = vmax.xlane.f32.xlu0 %v1843_v4  ;;  %v1846_v6 = vsel %vm1658_vm3, %v1746_v0, -inf }
 0x21f   : > { %v2180_v5 = vsel %vm1890_vm4, %v2082_v62, 0  ;;  %v3238_v62 = vld [vmem:[%s3603_s6] sm:$0xff]  }
 0x222   : > { %1847 = vmax.xlane.f32.xlu0 %v1846_v6  ;;  %v1791_v8 = vpop.f32.mrb[28].mxu0 }
 0x223   : > { %v1837_v9 = vpop.f32.mrb[28].mxu1  ;;  %v1792_v10 = vadd.f32 %v1791_v8, %v1656_v57  ;;  %v3065_v11 = vpop.f32.mrb[29].mxu0 }
 0x224   : > { %v3071_v12 = vpop.f32.mrb[29].mxu1  ;;  %v1794_v13 = vpop.f32.mrb[30].mxu0  ;;  %v1838_v14 = vadd.f32 %v1837_v9, %v1656_v57  ;;  %v2083_v9 = vld [vmem:[%s3586_s4 + $0xc] sm:$0xf] }
 0x225   : > { %v1840_v15 = vpop.f32.mrb[30].mxu1  ;;  %v3066_v16 = vpop.f32.mrb[31].mxu0  ;;  %v1849_v17 = vsel %vm1658_vm3, %v1792_v10, -inf }
 0x226   : > { %v3072_v18 = vpop.f32.mrb[31].mxu1  ;;  %1850 = vmax.xlane.f32.xlu1 %v1849_v17  ;;  %v1852_v19 = vsel %vm1658_vm3, %v1838_v14, -inf  ;;  %v2226_v15 = vsel %vm1890_vm4, %v2083_v9, 0 }
 0x22a   : > { %1853 = vmax.xlane.f32.xlu1 %v1852_v19 }
 0x2ab   : > { %v1845_v20 = vpop.xlane.xlu0 %1844 }
 0x2ac   : > { %v1855_v21 = vsub.f32 %v1700_v59, %v1845_v20 }
 0x2ae   : > { %v1859_v22 = vmul.f32 1.442695, %v1855_v21 }
 0x2af   : > { %v1848_v23 = vpop.xlane.xlu0 %1847 }
 0x2b0   : > { %3244 = vpow2.f32 %v1859_v22  ;;  %v1856_v24 = vsub.f32 %v1746_v0, %v1848_v23 }
 0x2b2   : > { %v1861_v26 = vmul.f32 1.442695, %v1856_v24 }
 0x2b3   : > { %v1851_v27 = vpop.xlane.xlu1 %1850 }
 0x2b4   : > { %3246 = vpow2.f32 %v1861_v26  ;;  %v1857_v28 = vsub.f32 %v1792_v10, %v1851_v27 }
 0x2b6   : > { %v1863_v31 = vmul.f32 1.442695, %v1857_v28 }
 0x2b7   : > { %v1854_v32 = vpop.xlane.xlu1 %1853 }
 0x2b8   : > { %3248 = vpow2.f32 %v1863_v31  ;;  %v1858_v33 = vsub.f32 %v1838_v14, %v1854_v32 }
 0x2ba   : > { %v3245_v36 = vpop.eup %3244  ;;  %v1865_v37 = vmul.f32 1.442695, %v1858_v33 }
 0x2bb   : > { %v1867_v38 = vsel %vm1658_vm3, %v3245_v36, 0.0  ;;  %v1883_v39 = vpack.c.bf16 %v3245_v36, %v3245_v36 }
 0x2bc   : > { %3250 = vpow2.f32 %v1865_v37  ;;  %1868 = vadd.xlane.f32.xlu0 %v1867_v38 }
 0x2bd   : > { %3076 = vmatmul.mubr.msk.bf16.vlgmr.msra.gmra.mrb[32].mxu0 %vm1658_vm3, %v1883_v39 }
 0x2be   : > { %v3247_v42 = vpop.eup %3246  ;;  %3086 = vmatpush3.bf16.msra.mxu0 %v1984_v40  ;;  %3087 = vmatprep.mubr.msk.bf16.mxu0 %vm3363_vm1, %v3362_v3 }
 0x2bf   : > { %v1870_v43 = vsel %vm1658_vm3, %v3247_v42, 0.0  ;;  %v1884_v44 = vpack.c.bf16 %v3247_v42, %v3247_v42  ;;  %3097 = vmatprep.subr.bf16.mxu0 %v3362_v3 }
 0x2c0   : > { %1871 = vadd.xlane.f32.xlu1 %v1870_v43 }
 0x2c1   : > { %3082 = vmatmul.mubr.msk.bf16.vlgmr.msra.gmra.mrb[32].mxu1 %vm1658_vm3, %v1884_v44 }
 0x2c2   : > { %v3249_v46 = vpop.eup %3248  ;;  %3092 = vmatpush3.bf16.msra.mxu1 %v2030_v45  ;;  %3093 = vmatprep.mubr.msk.bf16.mxu1 %vm3363_vm1, %v3362_v3 }
 0x2c3   : > { %v1873_v47 = vsel %vm1658_vm3, %v3249_v46, 0.0  ;;  %v1885_v48 = vpack.c.bf16 %v3249_v46, %v3249_v46  ;;  %3103 = vmatprep.subr.bf16.mxu1 %v3362_v3 }
 0x2c4   : > { %1874 = vadd.xlane.f32.xlu0 %v1873_v47 }
 0x2c5   : > { %3088 = vmatmul.mubr.msk.bf16.vlgmr.msra.gmra.mrb[36].mxu0 %vm1658_vm3, %v1885_v48 }
 0x2c6   : > { %v3251_v49 = vpop.eup %3250  ;;  %3099 = vmatprep.mubr.msk.bf16.mxu0 %vm3363_vm1, %v3362_v3  ;;  %3098 = vmatpush3.bf16.msra.mxu0 %v2088_v53 }
 0x2c7   : > { %v1876_v50 = vsel %vm1658_vm3, %v3251_v49, 0.0  ;;  %v1886_v51 = vpack.c.bf16 %v3251_v49, %v3251_v49  ;;  %3109 = vmatprep.subr.bf16.mxu0 %v3362_v3  ;;  %v2859_v49 = vld [vmem:[%s4034_s21] ss:$0 sm:$0xff] }
 0x2c8   : > { %1877 = vadd.xlane.f32.xlu1 %v1876_v50 }
 0x2c9   : > { %3094 = vmatmul.mubr.msk.bf16.vlgmr.msra.gmra.mrb[36].mxu1 %vm1658_vm3, %v1886_v51 }
 0x2ca   : > { %3105 = vmatprep.mubr.msk.bf16.mxu1 %vm3363_vm1, %v3362_v3  ;;  %3104 = vmatpush3.bf16.msra.mxu1 %v2134_v55 }
 0x2cb   : > { %3115 = vmatprep.subr.bf16.mxu1 %v3362_v3 }
 0x349   : > { %v1869_v56 = vpop.xlane.xlu0 %1868 }
 0x34a   : > { %3252 = vrcp.f32 %v1869_v56 }
 0x34d   : > { %v1872_v57 = vpop.xlane.xlu1 %1871 }
 0x34e   : > { %3254 = vrcp.f32 %v1872_v57 }
 0x351   : > { %v1875_v58 = vpop.xlane.xlu0 %1874 }
 0x352   : > { %3256 = vrcp.f32 %v1875_v58 }
 0x354   : > { %v3253_v60 = vpop.eup %3252 }
 0x355   : > { %v1878_v59 = vpop.xlane.xlu1 %1877 }
 0x356   : > { %3258 = vrcp.f32 %v1878_v59 }
 0x358   : > { %v3255_v6 = vpop.eup %3254 }
 0x35c   : > { %v3257_v16 = vpop.eup %3256 }
 0x360   : > { %v3259_v23 = vpop.eup %3258 }
 0x390   : > { %v1928_v61 = vpop.f32.mrb[32].mxu0 }
 0x391   : > { %v2072_v63 = vmul.f32 %v3253_v60, %v1928_v61  ;;  %v3077_v0 = vpop.f32.mrb[33].mxu0 }
 0x392   : > { %v1931_v1 = vpop.f32.mrb[34].mxu0 }
 0x393   : > { %v2076_v2 = vpack.c.bf16 %v2072_v63, %v2072_v63  ;;  %v3078_v4 = vpop.f32.mrb[35].mxu0  ;;  %v3239_v63 = vld [vmem:[%s3603_s6 + $0x8] sm:$0xff]   ;;  %s4037_s6 = sld [smem:[#allocation32_spill]] }
 0x394   : > { %v1974_v8 = vpop.f32.mrb[32].mxu1  ;;  %v2860_v4 = vld [vmem:[%s4036_s22] ss:$0 sm:$0xff] }
 0x395   : > { %v2073_v10 = vmul.f32 %v3255_v6, %v1974_v8  ;;  %v3083_v11 = vpop.f32.mrb[33].mxu1  ;;  %3100 = vmatmul.mubr.msk.bf16.vlgmr.msra.gmra.mrb[40].mxu0 %vm1658_vm3, %v2076_v2 }
 0x396   : > { %v1977_v12 = vpop.f32.mrb[34].mxu1  ;;  %3110 = vmatpush3.bf16.msra.mxu0 %v2180_v5  ;;  %3111 = vmatprep.mubr.msk.bf16.mxu0 %vm3363_vm1, %v3362_v3  ;;  %v3240_v11 = vld [vmem:[%s3617_s10] sm:$0xff]  }
 0x397   : > { %v2077_v13 = vpack.c.bf16 %v2073_v10, %v2073_v10  ;;  %v3084_v14 = vpop.f32.mrb[35].mxu1  ;;  %3121 = vmatprep.subr.bf16.mxu0 %v3362_v3  ;;  %v3241_v12 = vld [vmem:[%s3617_s10 + $0x8] sm:$0xff]  }
 0x398   : > { %v2020_v17 = vpop.f32.mrb[36].mxu0  ;;  %v3243_v14 = vld [vmem:[%s3617_s10 + $0x18] sm:$0xff]  }
 0x399   : > { %v2074_v18 = vmul.f32 %v3257_v16, %v2020_v17  ;;  %v3089_v19 = vpop.f32.mrb[37].mxu0  ;;  %3106 = vmatmul.mubr.msk.bf16.vlgmr.msra.gmra.mrb[40].mxu1 %vm1658_vm3, %v2077_v13  ;;  %s4038_s30 = scalar_lea.vmem %s4037_s6, %s3540_s26  ;;  %v3242_v13 = vld [vmem:[%s3617_s10 + $0x10] sm:$0xff]  }
 0x39a   : > { %v2023_v20 = vpop.f32.mrb[38].mxu0  ;;  %3116 = vmatpush3.bf16.msra.mxu1 %v2226_v15  ;;  %3117 = vmatprep.mubr.msk.bf16.mxu1 %vm3363_vm1, %v3362_v3  ;;  %v2861_v6 = vld [vmem:[%s4038_s30] ss:$0 sm:$0xff] }
 0x39b   : > { %v2078_v21 = vpack.c.bf16 %v2074_v18, %v2074_v18  ;;  %v3090_v22 = vpop.f32.mrb[39].mxu0  ;;  %3129 = vmatprep.subr.bf16.mxu1 %v3362_v3  ;;  %v2862_v15 = vld [vmem:[%s851_s7] ss:$0 sm:$0xff] }
 0x39c   : > { %v2066_v24 = vpop.f32.mrb[36].mxu1 }
 0x39d   : > { %v2075_v25 = vmul.f32 %v3259_v23, %v2066_v24  ;;  %v3095_v26 = vpop.f32.mrb[37].mxu1  ;;  %3112 = vmatmul.mubr.msk.bf16.vlgmr.msra.gmra.mrb[44].mxu0 %vm1658_vm3, %v2078_v21 }
 0x39e   : > { %v2069_v27 = vpop.f32.mrb[38].mxu1  ;;  %3125 = vmatprep.mubr.msk.bf16.mxu0 %vm3363_vm1, %v3362_v3  ;;  %3122 = vmatpush3.bf16.msra.mxu0 %v3238_v62 }
 0x39f   : > { %v2079_v28 = vpack.c.bf16 %v2075_v25, %v2075_v25  ;;  %v3096_v29 = vpop.f32.mrb[39].mxu1  ;;  %3123 = vmatprep.subr.bf16.mxu0 %v3362_v3 }
 0x3a1   : > { %3118 = vmatmul.mubr.msk.bf16.vlgmr.msra.gmra.mrb[44].mxu1 %vm1658_vm3, %v2079_v28 }
 0x3a2   : > { %3137 = vmatprep.mubr.msk.bf16.mxu1 %vm3363_vm1, %v3362_v3  ;;  %3124 = vmatpush3.bf16.msra.mxu0 %v3239_v63 }
 0x3a3   : > { %3130 = vmatpush3.bf16.msra.mxu1 %v3240_v11 }
 0x3a4   : > { %3131 = vmatprep.subr.bf16.mxu1 %v3362_v3 }
 0x3a7   : > { %3132 = vmatpush3.bf16.msra.mxu1 %v3241_v12 }
 0x3a8   : > { %3133 = vmatprep.subr.bf16.mxu1 %v3362_v3 }
 0x3ab   : > { %3134 = vmatpush3.bf16.msra.mxu1 %v3242_v13 }
 0x3ac   : > { %3135 = vmatprep.subr.bf16.mxu1 %v3362_v3 }
 0x3af   : > { %3136 = vmatpush3.bf16.msra.mxu1 %v3243_v14 }
 0x468   : > { %v2124_v30 = vpop.f32.mrb[40].mxu0 }
 0x469   : > { %v3101_v31 = vpop.f32.mrb[41].mxu0  ;;  %v2268_v35 = vsel %vm933_vm2, %v2124_v30, 0.0  ;;  %v2866_v30 = vld [vmem:[%s859_s9] ss:$0 sm:$0xff] }
 0x46a   : > { %v2127_v32 = vpop.f32.mrb[42].mxu0 }
 0x46b   : > { %v3102_v33 = vpop.f32.mrb[43].mxu0 }
 0x46c   : > { %v2170_v34 = vpop.f32.mrb[40].mxu1 }
 0x46d   : > { %v2269_v36 = vsel %vm933_vm2, %v2170_v34, 0.0  ;;  %v3107_v37 = vpop.f32.mrb[41].mxu1 }
 0x46e   : > { %v2270_v38 = vadd.f32 %v2269_v36, %v2268_v35  ;;  %v2173_v39 = vpop.f32.mrb[42].mxu1 }
 0x46f   : > { %v3108_v40 = vpop.f32.mrb[43].mxu1 }
 0x470   : > { %v2216_v41 = vpop.f32.mrb[44].mxu0 }
 0x471   : > { %v2271_v42 = vsel %vm933_vm2, %v2216_v41, 0.0  ;;  %v3113_v43 = vpop.f32.mrb[45].mxu0 }
 0x472   : > { %v2272_v44 = vadd.f32 %v2271_v42, %v2270_v38  ;;  %v2219_v45 = vpop.f32.mrb[46].mxu0 }
 0x473   : > { %v3114_v46 = vpop.f32.mrb[47].mxu0 }
 0x474   : > { %v2262_v47 = vpop.f32.mrb[44].mxu1 }
 0x475   : > { %v2273_v48 = vsel %vm933_vm2, %v2262_v47, 0.0  ;;  %v3119_v50 = vpop.f32.mrb[45].mxu1  ;;  %v2872_v47 = vld [vmem:[%s862_s16] ss:$0 sm:$0xff] }
 0x476   : > { %v2274_v51 = vadd.f32 %v2273_v48, %v2272_v44  ;;  %v2265_v52 = vpop.f32.mrb[46].mxu1 }
 0x477   : > { %v3120_v53 = vpop.f32.mrb[47].mxu1 }
 0x478   : > { %v2282_v54 = vadd.f32 %v2859_v49, %v2274_v51  ;;  %v2873_v49 = vld [vmem:[%s865_s11] ss:$0 sm:$0xff] }
 0x47a   : > { %v2283_v55 = vadd.f32 %v2282_v54, %v3641_v7 }
 0x47c   : > { %v2286_v56 = vsel %vm933_vm2, %v2283_v55, 0.0 }
 0x47d   : > { %2287 = vadd.xlane.f32.xlu0 %v2286_v56 }
 0x50a   : > { %v2288_v57 = vpop.xlane.xlu0 %2287 }
 0x50b   : > { %v2290_v58 = vmul.f32 0.03125, %v2288_v57 }
 0x50d   : > { %v2291_v59 = vsub.f32 %v2283_v55, %v2290_v58 }
 0x50f   : > { %v2292_v60 = vmul.f32 %v2291_v59, %v2291_v59 }
 0x511   : > { %v2293_v61 = vsel %vm933_vm2, %v2292_v60, 0.0 }
 0x512   : > { %2294 = vadd.xlane.f32.xlu1 %v2293_v61 }
 0x59f   : > { %v2295_v7 = vpop.xlane.xlu1 %2294 }
 0x5a0   : > { %v2296_v0 = vmul.f32 0.03125, %v2295_v7 }
 0x5a2   : > { %v2297_v1 = vadd.f32 1e-12, %v2296_v0 }
 0x5a4   : > { %3260 = vrsqrt.f32 %v2297_v1 }
 0x5ae   : > { %v3261_v2 = vpop.eup %3260 }
 0x5af   : > { %v2299_v5 = vmul.f32 %v3261_v2, %v2291_v59 }
 0x5b1   : > { %v2306_v8 = vmul.f32 %v2860_v4, %v2299_v5 }
 0x5b3   : > { %v2313_v9 = vadd.f32 %v2861_v6, %v2306_v8 }
 0x5b5   : > { %v2314_v10 = vpack.c.bf16 %v2313_v9, %v2313_v9 }
 0x5b7   : > { %3126 = vmatmul.mubr.msk.bf16.vlgmr.msra.gmra.mrb[48].mxu0 %vm933_vm2, %v2314_v10 }
 0x68a   : > { %v2375_v16 = vpop.f32.mrb[48].mxu0 }
 0x68b   : > { %v2376_v17 = vadd.f32 %v2862_v15, %v2375_v16  ;;  %v3127_v18 = vpop.f32.mrb[49].mxu0 }
 0x68c   : > { %v2378_v19 = vpop.f32.mrb[50].mxu0 }
 0x68d   : > { %v2381_v20 = vmul.f32 %v2376_v17, %v2376_v17  ;;  %v3128_v21 = vpop.f32.mrb[51].mxu0 }
 0x68f   : > { %v2382_v22 = vmul.f32 %v2381_v20, %v2376_v17 }
 0x691   : > { %v2383_v23 = vmul.f32 0.044715, %v2382_v22 }
 0x693   : > { %v2384_v24 = vadd.f32 %v2383_v23, %v2376_v17 }
 0x695   : > { %v2385_v25 = vmul.f32 0.7978846, %v2384_v24 }
 0x697   : > { %3262 = vtanh.f32 %v2385_v25 }
 0x6a1   : > { %v3263_v3 = vpop.eup %3262 }
 0x6a2   : > { %v2387_v26 = vadd.f32 1.0, %v3263_v3 }
 0x6a4   : > { %v2388_v27 = vmul.f32 0.5, %v2387_v26 }
 0x6a6   : > { %v2389_v28 = vmul.f32 %v2388_v27, %v2376_v17 }
 0x6a8   : > { %v2390_v29 = vpack.c.bf16 %v2389_v28, %v2389_v28 }
 0x6aa   : > { %3138 = vmatmul.mubr.msk.bf16.vlgmr.msra.gmra.mrb[48].mxu1 %vm2430_vm5, %v2390_v29 }
 0x77d   : > { %v2468_v31 = vpop.f32.mrb[48].mxu1 }
 0x77e   : > { %v2469_v32 = vadd.f32 %v2866_v30, %v2468_v31  ;;  %v3139_v33 = vpop.f32.mrb[49].mxu1 }
 0x77f   : > { %v2471_v34 = vpop.f32.mrb[50].mxu1 }
 0x780   : > { %v3140_v35 = vpop.f32.mrb[51].mxu1  ;;  %v2474_v36 = vadd.f32 %v2469_v32, %v2313_v9 }
 0x782   : > { %v2477_v37 = vsel %vm933_vm2, %v2474_v36, 0.0 }
 0x783   : > { %2478 = vadd.xlane.f32.xlu0 %v2477_v37 }
 0x810   : > { %v2479_v38 = vpop.xlane.xlu0 %2478 }
 0x811   : > { %v2480_v39 = vmul.f32 0.03125, %v2479_v38 }
 0x813   : > { %v2481_v40 = vsub.f32 %v2474_v36, %v2480_v39 }
 0x815   : > { %v2482_v41 = vmul.f32 %v2481_v40, %v2481_v40 }
 0x817   : > { %v2483_v42 = vsel %vm933_vm2, %v2482_v41, 0.0 }
 0x818   : > { %2484 = vadd.xlane.f32.xlu1 %v2483_v42 }
 0x8a5   : > { %v2485_v43 = vpop.xlane.xlu1 %2484 }
 0x8a6   : > { %v2486_v44 = vmul.f32 0.03125, %v2485_v43 }
 0x8a8   : > { %v2487_v45 = vadd.f32 1e-12, %v2486_v44 }
 0x8aa   : > { %3264 = vrsqrt.f32 %v2487_v45 }
 0x8b4   : > { %v3265_v46 = vpop.eup %3264 }
 0x8b5   : > { %v2489_v48 = vmul.f32 %v3265_v46, %v2481_v40  ;;  %2508 = sbr.rel (%p2874_p1) target bundleno = 2238 (0x8be), region = 100 }
 0x8b7   : > { %v2496_v50 = vmul.f32 %v2872_v47, %v2489_v48 }
 0x8b9   : > { %v2503_v51 = vadd.f32 %v2873_v49, %v2496_v50 }
 0x8bb   : > { %2504 = vst.msk [vmem:[#allocation2] sm:$0xff] %vm933_vm2, %v2503_v51  ;;  %v2509_v52 = vpack.c.bf16 (!%p2874_p1), %v2503_v51, %v2503_v51 }
 0x8bd   : > { %2511 = vst.msk [vmem:[%s795_s3] sm:$0xf] %vm2510_vm6, %v2509_v52 }
 0x8be PF: > { %s4043_s16 = sld [smem:[#allocation10_spill]]  ;;  %s4044_s27 = sld [smem:[#allocation7_spill]] }
 0x8bf   : > { %s4046_s28 = sld [smem:[#allocation38_spill]]  ;;  %s2526_s14 = sshll.u32 %s795_s3, 4  ;;  %s2527_s14 = int_to_ptr.vmem [resolvable:$true] %s2526_s14 }
 0x8c0   : > { %s3266_s25 = scalar_lea.vmem %s2527_s14, 64  ;;  %s3364_s1 = smov [#allocation3]  }
 0x8c1   : > { %p3267_p2 = scmp.ne.s32.totalorder %s2527_s14, %s3266_s25  ;;  %s3270_s6 = sshll.u32 %s3364_s1, 4  ;;  %s3271_s6 = int_to_ptr.vmem [resolvable:$false] %s3270_s6 }
 0x8c2   : > { %s3272_s30 = scalar_lea.vmem %s3271_s6, 128  ;;  %p3273_p6 = scmp.lt.s32.totalorder %s2527_s14, %s3271_s6 }
 0x8c3   : > { %p3268_p4 = pnand %p3267_p2, %p3509_p3  ;;  %p3274_p7 = scmp.lt.s32.totalorder %s3272_s30, %s3266_s25 }
 0x8c4   : > { %s2876_s29 = sshll.u32 %s4043_s16, 6  ;;  %s4048_s20 = sand.u32 1, %s4044_s27  }
 0x8c5   : > { %s4047_s21 = smov %s4046_s28  ;;  %s3889_s24 = scalar_lea.hbm %s4046_s28, %s2876_s29 }
 0x8c6   : > { %s2513_s22 = scalar_lea.sflag [#allocation4], %s4048_s20  ;;  %p3269_p5 = pneg %p3268_p4 }
 0x8c7   : > { %p3275_p8 = por %p3274_p7, %p3273_p6 }
 0x8c9   : > { %p3276_p10 = pnand %p3275_p8, %p3269_p5 }
 0x8cb   : > { %3279 = shalt.err (!%p3276_p10)
}
 0x8cc   : > { %s3280_s19 = scalar_lea.hbm %s3889_s24, 64  ;;  %s3284_s2 = scalar_lea.hbm %s4047_s21, 128 }
 0x8cd   : > { %p3281_p11 = scmp.ne.s32.totalorder %s3889_s24, %s3280_s19  ;;  %p3285_p0 = scmp.lt.u32.totalorder %s3889_s24, %s4047_s21 }
 0x8ce   : > { %p3286_p1 = scmp.lt.u32.totalorder %s3284_s2, %s3280_s19  ;;  %p3288_p4 = scmp.lt.u32.totalorder %s3280_s19, %s3889_s24 }
 0x8cf   : > { %p3282_p12 = pnand %p3281_p11, %p3509_p3 }
 0x8d0   : > { %p3287_p2 = por %p3286_p1, %p3285_p0 }
 0x8d1   : > { %p3283_p13 = pneg %p3282_p12 }
 0x8d2   : > { %p3289_p5 = por %p3288_p4, %p3287_p2 }
 0x8d4   : > { %p3290_p6 = pnand %p3289_p5, %p3283_p13 }
 0x8d6   : > { %3293 = shalt.err (!%p3290_p6)
}
 0x8d7   : > { %3141 = dma.vmem_to_hbm [thread:$0]  (%p3509_p3), %s2527_s14, 64, %s3889_s24, %s2513_s22  }
 0x8d8 PF: > { %s4049_s15 = sld [smem:[#allocation13_spill]]  ;;  %s4050_s9 = sld [smem:[#allocation6_spill]] }
 0x8de   : > { %p3147_p7 = scmp.ge.s32.totalorder %s4049_s15, 2  ;;  %s2538_s5 = sand.u32 1, %s4050_s9  }
 0x8df   : > { %s2539_s8 = scalar_lea.sflag [#allocation4], %s2538_s5 }
 0x8e0   : > { %p3144_p8 = pnand %p3147_p7, %p3519_p9 }
 0x8e2   : > { %3327 = dma.done.wait (!%p3144_p8), %s2539_s8, 64  }
 0x8e3   : > { %3329 = vsyncadd (!%p3144_p8), %s2539_s8, 4294967232  ;;  %s31_s20 = sadd.s32 1, %s4049_s15   ;;  %s4052_s27 = sld [smem:[#allocation7_spill]] }
 0x8e4   : > { %p28_p10 = scmp.ge.s32.totalorder %s31_s20, 6   ;;  %s4053_s28 = sld [smem:[#allocation8_spill]] }
 0x8e5   : > { %s4054_s29 = sld [smem:[#allocation18_spill]]  ;;  %s4055_s30 = sld [smem:[#allocation11_spill]] }
 0x8e6   : > { %s4056_s0 = sld [smem:[#allocation12_spill]]  ;;  %s4057_s19 = sld [smem:[#allocation14_spill]] }
 0x8e7   : > { %s4058_s1 = sld [smem:[#allocation16_spill]]  ;;  %30 = sbr.rel (!%p28_p10) target bundleno = 24 (0x18), region = 186 }
 0x8ee   :  { %2544 = vsyncpa [#allocation4], 1 }
 0x8ef   :  { %2546 = vsyncpa [#allocation4 + $0x1], 1 }

</bundles_post_ra>
